<compile_context>
chip_gen: v7x
topology: tpu7x:2x2x1
jax: 0.10.0
libtpu: 0.0.40
codegen_flags: <defaults>
</compile_context>

<pallas_src>
import math

import jax
import jax.numpy as jnp
from jax.experimental import pallas as pl
from jax.experimental.pallas import tpu as pltpu


# ----------------------------------------------------------------------------
# Layer sizing, replicating Generator_big.get_layer
# ----------------------------------------------------------------------------
def _layer_dims(latent_size, img_size, amount_layers=4):
    rel_size = int(img_size / latent_size)
    increase = math.log(rel_size, amount_layers)
    dims = []
    for layer in range(1, amount_layers):
        fin = max(round(increase ** (layer - 1) * latent_size), 1)
        fout = max(round(increase ** layer * latent_size), 1)
        dims.append((fin, fout))
    fin_last = max(round(increase ** (amount_layers - 1) * latent_size), 1)
    dims.append((fin_last, img_size))  # last layer maps straight to img_size
    return dims


# ----------------------------------------------------------------------------
# Kernel
# ----------------------------------------------------------------------------
def _leaky_relu(x, slope=0.2):
    # slope < 1  =>  leaky_relu(x) == max(x, slope*x): one mul + one max.
    return jnp.maximum(x, jnp.float32(slope) * x)


def _bn_train_folded(h, gamma, beta, eps=1e-5):
    """Training-mode BatchNorm1d (batch stats, biased variance) folded into a
    single scale/shift so per-element work is one mul + one add."""
    inv_b = jnp.float32(1.0 / h.shape[0])
    s1 = jnp.sum(h, axis=0, keepdims=True)
    s2 = jnp.sum(h * h, axis=0, keepdims=True)
    mean = s1 * inv_b
    # Clamp: E[x^2] - E[x]^2 can go slightly negative from f32 cancellation.
    var = jnp.maximum(s2 * inv_b - mean * mean, jnp.float32(0.0))
    scale = gamma * jax.lax.rsqrt(var + jnp.float32(eps))   # EUP rsqrt (free slot)
    shift = beta - mean * scale
    return h * scale + shift


def generator_big_kernel(
    x_ref,
    w1_ref, b1_ref, g1_ref, be1_ref,
    w2_ref, b2_ref, g2_ref, be2_ref,
    w3_ref, b3_ref, g3_ref, be3_ref,
    w4_ref, b4_ref,
    o_ref,
):
    def block(h_f32, w_ref, b_ref, g_ref, be_ref):
        # bf16 MXU operands (weights are already bf16), f32 accumulation.
        pre = jnp.dot(h_f32.astype(jnp.bfloat16), w_ref[...],
                      preferred_element_type=jnp.float32) + b_ref[...]
        return _bn_train_folded(_leaky_relu(pre), g_ref[...], be_ref[...])

    h = x_ref[...].astype(jnp.float32)
    h = block(h, w1_ref, b1_ref, g1_ref, be1_ref)
    h = block(h, w2_ref, b2_ref, g2_ref, be2_ref)
    h = block(h, w3_ref, b3_ref, g3_ref, be3_ref)

    # Final Linear -> ValueExtractor (identity) -> upper_softmax.
    logits = jnp.dot(h.astype(jnp.bfloat16), w4_ref[...],
                     preferred_element_type=jnp.float32) + b4_ref[...]

    m = jnp.max(logits, axis=1, keepdims=True)
    e = jnp.exp(logits - m)
    denom = jnp.sum(e, axis=1, keepdims=True)

    thr = jnp.float32(1.0 / o_ref.shape[1])
    # Division-free clamp decision: s < thr  <=>  e < denom * thr.  This keeps
    # the decision independent of the (approximate) reciprocal below.
    keep = e < denom * thr
    # Approximate reciprocal lowers to the EUP slot -> effectively free next to
    # the f32 VALU work of the epilogue.
    s = e * pl.reciprocal(denom, approx=True)
    # upper_softmax: keep s where s < 1/I, else 1.0
    o_ref[...] = jnp.where(keep, s, jnp.float32(1.0))


# ----------------------------------------------------------------------------
# Wrapper
# ----------------------------------------------------------------------------
def generator_big_forward(x, params, *, latent_size, img_size):
    B, d_in = x.shape
    assert d_in == latent_size, "input feature dim must equal latent_size"
    dims = _layer_dims(latent_size, img_size)

    # Weights are expected pre-converted to bf16 (done once in init_params /
    # checkpoint load), so no per-call convert ops are emitted here.
    args = (
        x,
        params["w1"], params["b1"], params["g1"], params["be1"],
        params["w2"], params["b2"], params["g2"], params["be2"],
        params["w3"], params["b3"], params["g3"], params["be3"],
        params["w4"], params["b4"],
    )

    # --- VMEM budgeting, sized per-generation (v5e/v6e: 128 MiB, v7x: 64 MiB) ---
    feat_sum = latent_size + sum(fo for _, fo in dims)
    act_bytes = 4 * B * feat_sum                       # f32 activations
    param_bytes = sum(int(a.size) * a.dtype.itemsize for a in args[1:])
    out_bytes = 4 * B * img_size
    resident = act_bytes + param_bytes + out_bytes

    try:
        vmem_capacity = int(pltpu.get_tpu_info().vmem_capacity_bytes)
    except Exception:
        vmem_capacity = 64 * 1024 * 1024               # conservative (v7x per-TC)
    headroom = 8 * 1024 * 1024                         # compiler-internal scratch
    resident_cap = int(0.75 * (vmem_capacity - headroom))
    if resident > resident_cap:
        # BatchNorm needs full-batch statistics; tiling the batch would require a
        # two-pass (stats then normalize) restructure. Guard instead of OOM-ing.
        raise ValueError("Batch too large for whole-batch-resident kernel on this "
                         "generation; restructure with two-pass BatchNorm to tile "
                         "the batch.")
    vmem_limit = int(min(max(2 * resident, 16 * 1024 * 1024),
                         vmem_capacity - headroom))

    flops = 2 * B * sum(fi * fo for fi, fo in dims)
    transcendentals = B * img_size + B + sum(fo for _, fo in dims[:3])
    cost = pl.CostEstimate(
        flops=flops,
        transcendentals=transcendentals,
        bytes_accessed=int(x.size) * x.dtype.itemsize + param_bytes + out_bytes,
    )

    vmem = pl.BlockSpec(memory_space=pltpu.MemorySpace.VMEM)
    return pl.pallas_call(
        generator_big_kernel,
        out_shape=jax.ShapeDtypeStruct((B, img_size), jnp.float32),
        in_specs=[vmem] * len(args),
        out_specs=vmem,
        compiler_params=pltpu.CompilerParams(vmem_limit_bytes=vmem_limit),
        cost_estimate=cost,
    )(*args)


# ----------------------------------------------------------------------------
# Params (PyTorch-default-like init) and pure-JAX reference
# ----------------------------------------------------------------------------
def init_params(key, latent_size, img_size):
    """Linear: U(-1/sqrt(fan_in), 1/sqrt(fan_in)) for W and b, W stored (in,out)
    and converted to bf16 ONCE here (not per forward call); BatchNorm: gamma=1,
    beta=0 (f32)."""
    dims = _layer_dims(latent_size, img_size)
    params = {}
    for i, (fin, fout) in enumerate(dims, start=1):
        key, kw, kb = jax.random.split(key, 3)
        bound = 1.0 / math.sqrt(fin)
        w = jax.random.uniform(kw, (fin, fout), jnp.float32,
                               minval=-bound, maxval=bound)
        params[f"w{i}"] = w.astype(jnp.bfloat16)       # one-time conversion
        params[f"b{i}"] = jax.random.uniform(kb, (1, fout), jnp.float32,
                                             minval=-bound, maxval=bound)
        if i < len(dims):  # BatchNorm follows the first three linear layers
            params[f"g{i}"] = jnp.ones((1, fout), jnp.float32)
            params[f"be{i}"] = jnp.zeros((1, fout), jnp.float32)
    return params


def reference_forward(x, params, img_size):
    """Pure-JAX reference using the same bf16-operand / f32-accumulate matmuls."""
    def mm(h, w):
        return jnp.dot(h.astype(jnp.bfloat16), w.astype(jnp.bfloat16),
                       preferred_element_type=jnp.float32)

    def bn(h, g, be, eps=1e-5):
        mean = jnp.mean(h, axis=0, keepdims=True)
        var = jnp.mean((h - mean) ** 2, axis=0, keepdims=True)
        return (h - mean) * jax.lax.rsqrt(var + eps) * g + be

    def lrelu(h):
        return jnp.where(h >= 0, h, 0.2 * h)

    h = x
    for i in (1, 2, 3):
        h = mm(h, params[f"w{i}"]) + params[f"b{i}"]
        h = bn(lrelu(h), params[f"g{i}"], params[f"be{i}"])
    logits = mm(h, params["w4"]) + params["b4"]
    s = jax.nn.softmax(logits, axis=1)
    thr = 1.0 / img_size
    clamped = jnp.where(s < thr, s, 0.0) + (s >= thr).astype(jnp.float32)
    return clamped, s


# ----------------------------------------------------------------------------
if __name__ == "__main__":
    LATENT_SIZE = 16
    IMG_SIZE = 256   # rel_size=16 -> increase=log_4(16)=2 -> 16->32->64->128->256
    BATCH = 64       # small test batch; kernel is whole-batch resident

    key = jax.random.PRNGKey(0)
    key, kx = jax.random.split(key)
    x = jax.random.normal(kx, (BATCH, LATENT_SIZE), jnp.float32)
    params = init_params(key, LATENT_SIZE, IMG_SIZE)

    out = generator_big_forward(x, params, latent_size=LATENT_SIZE, img_size=IMG_SIZE)
    out = jax.block_until_ready(out)

    ref, s_ref = reference_forward(x, params, IMG_SIZE)
    assert out.shape == (BATCH, IMG_SIZE)

    # Entries whose softmax probability sits essentially on the 1/I clamp threshold
    # can legitimately flip (≈0.0039 vs 1.0) under tiny rounding differences between
    # the MXU and XLA reduction orders; exclude those from the comparison.
    thr = 1.0 / IMG_SIZE
    near_thr = jnp.abs(s_ref - thr) < 1e-2 * thr
    ok = jnp.isclose(out, ref, atol=1e-3, rtol=1e-3) | near_thr
    assert bool(jnp.all(ok)), "mismatch vs reference"
    # Mirror the module's NaN guard (host-side).
    assert bool(jnp.isfinite(out).all()), "Generator produced NaN values."

    print("KERNEL_OK")
</pallas_src>

<mosaic_0001>
module attributes {stable_mosaic.version = 11 : i64} {
  func.func @generator_big_kernel(%arg0: memref<64x16xf32, #tpu.memory_space<vmem>>, %arg1: memref<16x32xbf16, #tpu.memory_space<vmem>>, %arg2: memref<1x32xf32, #tpu.memory_space<vmem>>, %arg3: memref<1x32xf32, #tpu.memory_space<vmem>>, %arg4: memref<1x32xf32, #tpu.memory_space<vmem>>, %arg5: memref<32x64xbf16, #tpu.memory_space<vmem>>, %arg6: memref<1x64xf32, #tpu.memory_space<vmem>>, %arg7: memref<1x64xf32, #tpu.memory_space<vmem>>, %arg8: memref<1x64xf32, #tpu.memory_space<vmem>>, %arg9: memref<64x128xbf16, #tpu.memory_space<vmem>>, %arg10: memref<1x128xf32, #tpu.memory_space<vmem>>, %arg11: memref<1x128xf32, #tpu.memory_space<vmem>>, %arg12: memref<1x128xf32, #tpu.memory_space<vmem>>, %arg13: memref<128x256xbf16, #tpu.memory_space<vmem>>, %arg14: memref<1x256xf32, #tpu.memory_space<vmem>>, %arg15: memref<64x256xf32, #tpu.memory_space<vmem>>) attributes {dimension_semantics = [], scalar_prefetch = 0 : i64, scratch_operands = 0 : i64, tpu.core_type = #tpu.core_type<tc>} {
    %c0 = arith.constant 0 : index
    %c0_0 = arith.constant 0 : index
    %0 = vector.load %arg0[%c0, %c0_0] : memref<64x16xf32, #tpu.memory_space<vmem>>, vector<64x16xf32>
    %1 = arith.truncf %0 : vector<64x16xf32> to vector<64x16xbf16>
    %c0_1 = arith.constant 0 : index
    %c0_2 = arith.constant 0 : index
    %2 = vector.load %arg1[%c0_1, %c0_2] : memref<16x32xbf16, #tpu.memory_space<vmem>>, vector<16x32xbf16>
    %cst = arith.constant dense<0.000000e+00> : vector<64x32xf32>
    %3 = tpu.matmul %1, %2, %cst {dimension_numbers = #tpu.dot_dimension_numbers<[1], [0], [0], [1], [0, 0, 1, 1], [], []>} : vector<64x16xbf16>, vector<16x32xbf16>, vector<64x32xf32> -> vector<64x32xf32>
    %c0_3 = arith.constant 0 : index
    %c0_4 = arith.constant 0 : index
    %4 = vector.load %arg2[%c0_3, %c0_4] : memref<1x32xf32, #tpu.memory_space<vmem>>, vector<1x32xf32>
    %5 = vector.broadcast %4 : vector<1x32xf32> to vector<64x32xf32>
    %6 = arith.addf %3, %5 : vector<64x32xf32>
    %cst_5 = arith.constant 2.000000e-01 : f32
    %7 = vector.broadcast %cst_5 : f32 to vector<64x32xf32>
    %8 = arith.mulf %7, %6 : vector<64x32xf32>
    %9 = arith.maximumf %6, %8 : vector<64x32xf32>
    %c0_6 = arith.constant 0 : index
    %c0_7 = arith.constant 0 : index
    %10 = vector.load %arg3[%c0_6, %c0_7] : memref<1x32xf32, #tpu.memory_space<vmem>>, vector<1x32xf32>
    %c0_8 = arith.constant 0 : index
    %c0_9 = arith.constant 0 : index
    %11 = vector.load %arg4[%c0_8, %c0_9] : memref<1x32xf32, #tpu.memory_space<vmem>>, vector<1x32xf32>
    %cst_10 = arith.constant dense<0.000000e+00> : vector<32xf32>
    %12 = vector.multi_reduction <add>, %9, %cst_10 [0] : vector<64x32xf32> to vector<32xf32>
    %13 = vector.shape_cast %12 : vector<32xf32> to vector<1x32xf32>
    %14 = arith.mulf %9, %9 : vector<64x32xf32>
    %cst_11 = arith.constant dense<0.000000e+00> : vector<32xf32>
    %15 = vector.multi_reduction <add>, %14, %cst_11 [0] : vector<64x32xf32> to vector<32xf32>
    %16 = vector.shape_cast %15 : vector<32xf32> to vector<1x32xf32>
    %cst_12 = arith.constant 1.562500e-02 : f32
    %17 = vector.broadcast %cst_12 : f32 to vector<1x32xf32>
    %18 = arith.mulf %13, %17 : vector<1x32xf32>
    %cst_13 = arith.constant 1.562500e-02 : f32
    %19 = vector.broadcast %cst_13 : f32 to vector<1x32xf32>
    %20 = arith.mulf %16, %19 : vector<1x32xf32>
    %21 = arith.mulf %18, %18 : vector<1x32xf32>
    %22 = arith.subf %20, %21 : vector<1x32xf32>
    %cst_14 = arith.constant 0.000000e+00 : f32
    %23 = vector.broadcast %cst_14 : f32 to vector<1x32xf32>
    %24 = arith.maximumf %22, %23 : vector<1x32xf32>
    %cst_15 = arith.constant 9.99999974E-6 : f32
    %25 = vector.broadcast %cst_15 : f32 to vector<1x32xf32>
    %26 = arith.addf %24, %25 : vector<1x32xf32>
    %27 = math.rsqrt %26 : vector<1x32xf32>
    %28 = arith.mulf %10, %27 : vector<1x32xf32>
    %29 = arith.mulf %18, %28 : vector<1x32xf32>
    %30 = arith.subf %11, %29 : vector<1x32xf32>
    %31 = vector.broadcast %28 : vector<1x32xf32> to vector<64x32xf32>
    %32 = arith.mulf %9, %31 : vector<64x32xf32>
    %33 = vector.broadcast %30 : vector<1x32xf32> to vector<64x32xf32>
    %34 = arith.addf %32, %33 : vector<64x32xf32>
    %35 = arith.truncf %34 : vector<64x32xf32> to vector<64x32xbf16>
    %c0_16 = arith.constant 0 : index
    %c0_17 = arith.constant 0 : index
    %36 = vector.load %arg5[%c0_16, %c0_17] : memref<32x64xbf16, #tpu.memory_space<vmem>>, vector<32x64xbf16>
    %cst_18 = arith.constant dense<0.000000e+00> : vector<64x64xf32>
    %37 = tpu.matmul %35, %36, %cst_18 {dimension_numbers = #tpu.dot_dimension_numbers<[1], [0], [0], [1], [0, 0, 1, 1], [], []>} : vector<64x32xbf16>, vector<32x64xbf16>, vector<64x64xf32> -> vector<64x64xf32>
    %c0_19 = arith.constant 0 : index
    %c0_20 = arith.constant 0 : index
    %38 = vector.load %arg6[%c0_19, %c0_20] : memref<1x64xf32, #tpu.memory_space<vmem>>, vector<1x64xf32>
    %39 = vector.broadcast %38 : vector<1x64xf32> to vector<64x64xf32>
    %40 = arith.addf %37, %39 : vector<64x64xf32>
    %cst_21 = arith.constant 2.000000e-01 : f32
    %41 = vector.broadcast %cst_21 : f32 to vector<64x64xf32>
    %42 = arith.mulf %41, %40 : vector<64x64xf32>
    %43 = arith.maximumf %40, %42 : vector<64x64xf32>
    %c0_22 = arith.constant 0 : index
    %c0_23 = arith.constant 0 : index
    %44 = vector.load %arg7[%c0_22, %c0_23] : memref<1x64xf32, #tpu.memory_space<vmem>>, vector<1x64xf32>
    %c0_24 = arith.constant 0 : index
    %c0_25 = arith.constant 0 : index
    %45 = vector.load %arg8[%c0_24, %c0_25] : memref<1x64xf32, #tpu.memory_space<vmem>>, vector<1x64xf32>
    %cst_26 = arith.constant dense<0.000000e+00> : vector<64xf32>
    %46 = vector.multi_reduction <add>, %43, %cst_26 [0] : vector<64x64xf32> to vector<64xf32>
    %47 = vector.shape_cast %46 : vector<64xf32> to vector<1x64xf32>
    %48 = arith.mulf %43, %43 : vector<64x64xf32>
    %cst_27 = arith.constant dense<0.000000e+00> : vector<64xf32>
    %49 = vector.multi_reduction <add>, %48, %cst_27 [0] : vector<64x64xf32> to vector<64xf32>
    %50 = vector.shape_cast %49 : vector<64xf32> to vector<1x64xf32>
    %cst_28 = arith.constant 1.562500e-02 : f32
    %51 = vector.broadcast %cst_28 : f32 to vector<1x64xf32>
    %52 = arith.mulf %47, %51 : vector<1x64xf32>
    %cst_29 = arith.constant 1.562500e-02 : f32
    %53 = vector.broadcast %cst_29 : f32 to vector<1x64xf32>
    %54 = arith.mulf %50, %53 : vector<1x64xf32>
    %55 = arith.mulf %52, %52 : vector<1x64xf32>
    %56 = arith.subf %54, %55 : vector<1x64xf32>
    %cst_30 = arith.constant 0.000000e+00 : f32
    %57 = vector.broadcast %cst_30 : f32 to vector<1x64xf32>
    %58 = arith.maximumf %56, %57 : vector<1x64xf32>
    %cst_31 = arith.constant 9.99999974E-6 : f32
    %59 = vector.broadcast %cst_31 : f32 to vector<1x64xf32>
    %60 = arith.addf %58, %59 : vector<1x64xf32>
    %61 = math.rsqrt %60 : vector<1x64xf32>
    %62 = arith.mulf %44, %61 : vector<1x64xf32>
    %63 = arith.mulf %52, %62 : vector<1x64xf32>
    %64 = arith.subf %45, %63 : vector<1x64xf32>
    %65 = vector.broadcast %62 : vector<1x64xf32> to vector<64x64xf32>
    %66 = arith.mulf %43, %65 : vector<64x64xf32>
    %67 = vector.broadcast %64 : vector<1x64xf32> to vector<64x64xf32>
    %68 = arith.addf %66, %67 : vector<64x64xf32>
    %69 = arith.truncf %68 : vector<64x64xf32> to vector<64x64xbf16>
    %c0_32 = arith.constant 0 : index
    %c0_33 = arith.constant 0 : index
    %70 = vector.load %arg9[%c0_32, %c0_33] : memref<64x128xbf16, #tpu.memory_space<vmem>>, vector<64x128xbf16>
    %cst_34 = arith.constant dense<0.000000e+00> : vector<64x128xf32>
    %71 = tpu.matmul %69, %70, %cst_34 {dimension_numbers = #tpu.dot_dimension_numbers<[1], [0], [0], [1], [0, 0, 1, 1], [], []>} : vector<64x64xbf16>, vector<64x128xbf16>, vector<64x128xf32> -> vector<64x128xf32>
    %c0_35 = arith.constant 0 : index
    %c0_36 = arith.constant 0 : index
    %72 = vector.load %arg10[%c0_35, %c0_36] : memref<1x128xf32, #tpu.memory_space<vmem>>, vector<1x128xf32>
    %73 = vector.broadcast %72 : vector<1x128xf32> to vector<64x128xf32>
    %74 = arith.addf %71, %73 : vector<64x128xf32>
    %cst_37 = arith.constant 2.000000e-01 : f32
    %75 = vector.broadcast %cst_37 : f32 to vector<64x128xf32>
    %76 = arith.mulf %75, %74 : vector<64x128xf32>
    %77 = arith.maximumf %74, %76 : vector<64x128xf32>
    %c0_38 = arith.constant 0 : index
    %c0_39 = arith.constant 0 : index
    %78 = vector.load %arg11[%c0_38, %c0_39] : memref<1x128xf32, #tpu.memory_space<vmem>>, vector<1x128xf32>
    %c0_40 = arith.constant 0 : index
    %c0_41 = arith.constant 0 : index
    %79 = vector.load %arg12[%c0_40, %c0_41] : memref<1x128xf32, #tpu.memory_space<vmem>>, vector<1x128xf32>
    %cst_42 = arith.constant dense<0.000000e+00> : vector<128xf32>
    %80 = vector.multi_reduction <add>, %77, %cst_42 [0] : vector<64x128xf32> to vector<128xf32>
    %81 = vector.shape_cast %80 : vector<128xf32> to vector<1x128xf32>
    %82 = arith.mulf %77, %77 : vector<64x128xf32>
    %cst_43 = arith.constant dense<0.000000e+00> : vector<128xf32>
    %83 = vector.multi_reduction <add>, %82, %cst_43 [0] : vector<64x128xf32> to vector<128xf32>
    %84 = vector.shape_cast %83 : vector<128xf32> to vector<1x128xf32>
    %cst_44 = arith.constant 1.562500e-02 : f32
    %85 = vector.broadcast %cst_44 : f32 to vector<1x128xf32>
    %86 = arith.mulf %81, %85 : vector<1x128xf32>
    %cst_45 = arith.constant 1.562500e-02 : f32
    %87 = vector.broadcast %cst_45 : f32 to vector<1x128xf32>
    %88 = arith.mulf %84, %87 : vector<1x128xf32>
    %89 = arith.mulf %86, %86 : vector<1x128xf32>
    %90 = arith.subf %88, %89 : vector<1x128xf32>
    %cst_46 = arith.constant 0.000000e+00 : f32
    %91 = vector.broadcast %cst_46 : f32 to vector<1x128xf32>
    %92 = arith.maximumf %90, %91 : vector<1x128xf32>
    %cst_47 = arith.constant 9.99999974E-6 : f32
    %93 = vector.broadcast %cst_47 : f32 to vector<1x128xf32>
    %94 = arith.addf %92, %93 : vector<1x128xf32>
    %95 = math.rsqrt %94 : vector<1x128xf32>
    %96 = arith.mulf %78, %95 : vector<1x128xf32>
    %97 = arith.mulf %86, %96 : vector<1x128xf32>
    %98 = arith.subf %79, %97 : vector<1x128xf32>
    %99 = vector.broadcast %96 : vector<1x128xf32> to vector<64x128xf32>
    %100 = arith.mulf %77, %99 : vector<64x128xf32>
    %101 = vector.broadcast %98 : vector<1x128xf32> to vector<64x128xf32>
    %102 = arith.addf %100, %101 : vector<64x128xf32>
    %103 = arith.truncf %102 : vector<64x128xf32> to vector<64x128xbf16>
    %c0_48 = arith.constant 0 : index
    %c0_49 = arith.constant 0 : index
    %104 = vector.load %arg13[%c0_48, %c0_49] : memref<128x256xbf16, #tpu.memory_space<vmem>>, vector<128x256xbf16>
    %cst_50 = arith.constant dense<0.000000e+00> : vector<64x256xf32>
    %105 = tpu.matmul %103, %104, %cst_50 {dimension_numbers = #tpu.dot_dimension_numbers<[1], [0], [0], [1], [0, 0, 1, 1], [], []>} : vector<64x128xbf16>, vector<128x256xbf16>, vector<64x256xf32> -> vector<64x256xf32>
    %c0_51 = arith.constant 0 : index
    %c0_52 = arith.constant 0 : index
    %106 = vector.load %arg14[%c0_51, %c0_52] : memref<1x256xf32, #tpu.memory_space<vmem>>, vector<1x256xf32>
    %107 = vector.broadcast %106 : vector<1x256xf32> to vector<64x256xf32>
    %108 = arith.addf %105, %107 : vector<64x256xf32>
    %cst_53 = arith.constant dense<0xFF800000> : vector<64xf32>
    %109 = vector.multi_reduction <maximumf>, %108, %cst_53 [1] : vector<64x256xf32> to vector<64xf32>
    %110 = vector.shape_cast %109 : vector<64xf32> to vector<64x1xf32>
    %111 = vector.broadcast %110 : vector<64x1xf32> to vector<64x256xf32>
    %112 = arith.subf %108, %111 : vector<64x256xf32>
    %113 = math.exp %112 : vector<64x256xf32>
    %cst_54 = arith.constant dense<0.000000e+00> : vector<64xf32>
    %114 = vector.multi_reduction <add>, %113, %cst_54 [1] : vector<64x256xf32> to vector<64xf32>
    %115 = vector.shape_cast %114 : vector<64xf32> to vector<64x1xf32>
    %cst_55 = arith.constant 3.906250e-03 : f32
    %116 = vector.broadcast %cst_55 : f32 to vector<64x1xf32>
    %117 = arith.mulf %115, %116 : vector<64x1xf32>
    %118 = vector.broadcast %117 : vector<64x1xf32> to vector<64x256xf32>
    %119 = arith.cmpf olt, %113, %118 : vector<64x256xf32>
    %120 = tpu.reciprocal %115 {approx = true} : vector<64x1xf32> -> vector<64x1xf32>
    %121 = vector.broadcast %120 : vector<64x1xf32> to vector<64x256xf32>
    %122 = arith.mulf %113, %121 : vector<64x256xf32>
    %cst_56 = arith.constant 1.000000e+00 : f32
    %123 = vector.broadcast %cst_56 : f32 to vector<64x256xf32>
    %124 = arith.select %119, %122, %123 : vector<64x256xi1>, vector<64x256xf32>
    %c0_57 = arith.constant 0 : index
    %c0_58 = arith.constant 0 : index
    %125 = vector.load %arg15[%c0_57, %c0_58] : memref<64x256xf32, #tpu.memory_space<vmem>>, vector<64x256xf32>
    tpu.vector_store %arg15[%c0_57, %c0_58], %124 {strides = array<i32>} : memref<64x256xf32, #tpu.memory_space<vmem>>, vector<64x256xf32>,
    return
  }
}

</mosaic_0001>

<bundles_post_ra>
// kernel: tpu_custom_call.1
= control target key start
LH: loop header
LB: loop body
LE: loop exit
PB: predicated region body
PF: predicated region fallthrough
CT: control target
= control target key end

     0   :  { %20 = vsyncpa [#allocation3], 0  ;;  %s2239_s0 = inlined_call_operand.vmem [shape: f32[64,16], index: 0, kind: input, shape index: {}]   ;;  %s2240_s1 = inlined_call_operand.hbm [shape: bf16[16,32], index: 1, kind: input, shape index: {}]   ;;  %s2241_s2 = inlined_call_operand.vmem [shape: f32[1,32], index: 2, kind: input, shape index: {}]   ;;  %s2242_s3 = inlined_call_operand.hbm [shape: f32[1,32], index: 3, kind: input, shape index: {}]   ;;  %s2243_s4 = inlined_call_operand.hbm [shape: f32[1,32], index: 4, kind: input, shape index: {}]   ;;  %s2244_s5 = inlined_call_operand.hbm [shape: bf16[32,64], index: 5, kind: input, shape index: {}]   ;;  %s2245_s6 = inlined_call_operand.hbm [shape: f32[1,64], index: 6, kind: input, shape index: {}]   ;;  %s2246_s7 = inlined_call_operand.hbm [shape: f32[1,64], index: 7, kind: input, shape index: {}]   ;;  %s2247_s8 = inlined_call_operand.hbm [shape: f32[1,64], index: 8, kind: input, shape index: {}]   ;;  %s2248_s9 = inlined_call_operand.hbm [shape: bf16[64,128], index: 9, kind: input, shape index: {}]   ;;  %s2249_s10 = inlined_call_operand.hbm [shape: f32[1,128], index: 10, kind: input, shape index: {}]   ;;  %s2250_s11 = inlined_call_operand.hbm [shape: f32[1,128], index: 11, kind: input, shape index: {}]   ;;  %s2251_s12 = inlined_call_operand.hbm [shape: f32[1,128], index: 12, kind: input, shape index: {}]   ;;  %s2252_s13 = inlined_call_operand.vmem [shape: bf16[128,256], index: 13, kind: input, shape index: {}]   ;;  %s2253_s14 = inlined_call_operand.vmem [shape: f32[1,256], index: 14, kind: input, shape index: {}]   ;;  %s2254_s15 = inlined_call_operand.hbm [shape: f32[64,256], index: 15, kind: output, shape index: {}]  }
   0x1   :  { %21 = vsyncpa [#allocation6], 0 }
   0x2   :  { %22 = vsyncpa [#allocation9], 0 }
   0x3   :  { %23 = vsyncpa [#allocation12], 0 }
   0x4   :  { %24 = vsyncpa [#allocation15], 0 }
   0x5   :  { %25 = vsyncpa [#allocation18], 0 }
   0x6   :  { %26 = vsyncpa [#allocation4], 0  ;;  %s1676_s18 = smov [#allocation5]   ;;  %s1398_s22 = scalar_lea.hbm %s2242_s3, 16 }
   0x7   :  { %s49_s19 = sshll.u32 %s1676_s18, 4  ;;  %p1399_p0 = scmp.ne.s32.totalorder %s2242_s3, %s1398_s22  ;;  %s50_s19 = int_to_ptr.vmem [resolvable:$true] %s49_s19 }
   0x8   :  { %p1402_p1 = scmp.lt.u32.totalorder %s1398_s22, %s2242_s3 }
   0xa   :  { %p1404_p2 = pnand %p1402_p1, %p1399_p0 }
   0xc   :  { %1407 = shalt.err (!%p1404_p2)
}
   0xd   :  { %s1408_s27 = scalar_lea.vmem %s50_s19, 16  ;;  %s1412_s28 = scalar_lea.vmem %s50_s19, 32 }
   0xe   :  { %p1409_p3 = scmp.ne.s32.totalorder %s50_s19, %s1408_s27  ;;  %p1413_p4 = scmp.lt.s32.totalorder %s50_s19, %s50_s19 }
   0xf   :  { %p1414_p5 = scmp.lt.s32.totalorder %s1412_s28, %s1408_s27 }
  0x11   :  { %p1415_p6 = por %p1414_p5, %p1413_p4 }
  0x13   :  { %p1416_p7 = pnand %p1415_p6, %p1409_p3 }
  0x15   :  { %1419 = shalt.err (!%p1416_p7)
}
  0x16   :  { %52 = dma.hbm_to_vmem [thread:$0]  %s2242_s3, 16, %s50_s19, [#allocation6]  }
  0x17   :  { %s1677_s16 = smov [#allocation8]   ;;  %s1678_s18 = smov [#allocation11]  }
  0x18   :  { %s68_s17 = sshll.u32 %s1677_s16, 4  ;;  %s91_s20 = sshll.u32 %s1678_s18, 4  ;;  %s69_s17 = int_to_ptr.vmem [resolvable:$true] %s68_s17  ;;  %s92_s20 = int_to_ptr.vmem [resolvable:$true] %s91_s20 }
  0x19   :  { %s1420_s23 = scalar_lea.hbm %s2244_s5, 256 }
  0x1a   :  { %p1421_p8 = scmp.ne.s32.totalorder %s2244_s5, %s1420_s23  ;;  %p1424_p9 = scmp.lt.u32.totalorder %s1420_s23, %s2244_s5 }
  0x1c   :  { %p1426_p10 = pnand %p1424_p9, %p1421_p8 }
  0x1e   :  { %1429 = shalt.err (!%p1426_p10)
}
  0x1f   :  { %s1430_s3 = scalar_lea.vmem %s69_s17, 256  ;;  %p1435_p12 = scmp.lt.s32.totalorder %s69_s17, %s69_s17 }
  0x20   :  { %p1431_p11 = scmp.ne.s32.totalorder %s69_s17, %s1430_s3  ;;  %p1436_p13 = scmp.lt.s32.totalorder %s1430_s3, %s1430_s3 }
  0x22   :  { %p1437_p0 = por %p1436_p13, %p1435_p12 }
  0x24   :  { %p1438_p1 = pnand %p1437_p0, %p1431_p11 }
  0x26   :  { %1441 = shalt.err (!%p1438_p1)
}
  0x27   :  { %s1679_s19 = smov 64   ;;  %s1680_s28 = smov 4  }
  0x28   :  { %74 = dma.hbm_to_vmem [thread:$0]  %s2244_s5, 256, %s69_s17, [#allocation9], %s1679_s19, %s1679_s19, %s1680_s28  }
  0x29   :  { %s1442_s21 = scalar_lea.hbm %s2246_s7, 16 }
  0x2a   :  { %p1443_p2 = scmp.ne.s32.totalorder %s2246_s7, %s1442_s21  ;;  %p1446_p3 = scmp.lt.u32.totalorder %s1442_s21, %s2246_s7 }
  0x2c   :  { %p1448_p4 = pnand %p1446_p3, %p1443_p2 }
  0x2e   :  { %1451 = shalt.err (!%p1448_p4)
}
  0x2f   :  { %s1452_s26 = scalar_lea.vmem %s92_s20, 16  ;;  %s1456_s27 = scalar_lea.vmem %s92_s20, 32 }
  0x30   :  { %p1453_p5 = scmp.ne.s32.totalorder %s92_s20, %s1452_s26  ;;  %p1457_p6 = scmp.lt.s32.totalorder %s92_s20, %s92_s20 }
  0x31   :  { %p1458_p7 = scmp.lt.s32.totalorder %s1456_s27, %s1452_s26 }
  0x33   :  { %p1459_p8 = por %p1458_p7, %p1457_p6 }
  0x35   :  { %p1460_p9 = pnand %p1459_p8, %p1453_p5 }
  0x37   :  { %1463 = shalt.err (!%p1460_p9)
}
  0x38   :  { %94 = dma.hbm_to_vmem [thread:$0]  %s2246_s7, 16, %s92_s20, [#allocation12]  }
  0x39   :  { %s1681_s3 = smov [#allocation14]   ;;  %s1682_s30 = smov [#allocation17]  }
  0x3a   :  { %s110_s29 = sshll.u32 %s1681_s3, 4  ;;  %s133_s16 = sshll.u32 %s1682_s30, 4  ;;  %s111_s29 = int_to_ptr.vmem [resolvable:$true] %s110_s29  ;;  %s134_s16 = int_to_ptr.vmem [resolvable:$true] %s133_s16 }
  0x3b   :  { %s1464_s22 = scalar_lea.hbm %s2248_s9, 512 }
  0x3c   :  { %p1465_p10 = scmp.ne.s32.totalorder %s2248_s9, %s1464_s22  ;;  %p1468_p11 = scmp.lt.u32.totalorder %s1464_s22, %s2248_s9 }
  0x3e   :  { %p1470_p12 = pnand %p1468_p11, %p1465_p10 }
  0x40   :  { %1473 = shalt.err (!%p1470_p12)
}
  0x41   :  { %s1474_s7 = scalar_lea.vmem %s111_s29, 512  ;;  %p1479_p0 = scmp.lt.s32.totalorder %s111_s29, %s111_s29 }
  0x42   :  { %p1475_p13 = scmp.ne.s32.totalorder %s111_s29, %s1474_s7  ;;  %p1480_p1 = scmp.lt.s32.totalorder %s1474_s7, %s1474_s7 }
  0x44   :  { %p1481_p2 = por %p1480_p1, %p1479_p0 }
  0x46   :  { %p1482_p3 = pnand %p1481_p2, %p1475_p13 }
  0x48   :  { %1485 = shalt.err (!%p1482_p3)
}
  0x49   :  { %116 = dma.hbm_to_vmem [thread:$0]  %s2248_s9, 512, %s111_s29, [#allocation15], %s1679_s19, %s1679_s19, %s1680_s28  }
  0x4a   :  { %s1486_s3 = scalar_lea.hbm %s2250_s11, 16 }
  0x4b   :  { %p1487_p4 = scmp.ne.s32.totalorder %s2250_s11, %s1486_s3  ;;  %p1490_p5 = scmp.lt.u32.totalorder %s1486_s3, %s2250_s11 }
  0x4d   :  { %p1492_p6 = pnand %p1490_p5, %p1487_p4 }
  0x4f   :  { %1495 = shalt.err (!%p1492_p6)
}
  0x50   :  { %s1496_s23 = scalar_lea.vmem %s134_s16, 16  ;;  %s1500_s24 = scalar_lea.vmem %s134_s16, 32 }
  0x51   :  { %p1497_p7 = scmp.ne.s32.totalorder %s134_s16, %s1496_s23  ;;  %p1501_p8 = scmp.lt.s32.totalorder %s134_s16, %s134_s16 }
  0x52   :  { %p1502_p9 = scmp.lt.s32.totalorder %s1500_s24, %s1496_s23 }
  0x54   :  { %p1503_p10 = por %p1502_p9, %p1501_p8 }
  0x56   :  { %p1504_p11 = pnand %p1503_p10, %p1497_p7 }
  0x58   :  { %1507 = shalt.err (!%p1504_p11)
}
  0x59   :  { %136 = dma.hbm_to_vmem [thread:$0]  %s2250_s11, 16, %s134_s16, [#allocation18]  }
  0x5a   :  { %s1683_s25 = smov [#allocation2]   ;;  %s1684_s7 = smov [#allocation7]  }
  0x5b   :  { %s34_s26 = sshll.u32 %s1683_s25, 4  ;;  %s59_s20 = sshll.u32 %s1684_s7, 4  ;;  %s35_s26 = int_to_ptr.vmem [resolvable:$true] %s34_s26  ;;  %s60_s20 = int_to_ptr.vmem [resolvable:$true] %s59_s20 }
  0x5c   :  { %s1508_s17 = scalar_lea.hbm %s2240_s1, 128 }
  0x5d   :  { %p1509_p12 = scmp.ne.s32.totalorder %s2240_s1, %s1508_s17  ;;  %p1512_p13 = scmp.lt.u32.totalorder %s1508_s17, %s2240_s1 }
  0x5f   :  { %p1514_p0 = pnand %p1512_p13, %p1509_p12 }
  0x61   :  { %1517 = shalt.err (!%p1514_p0)
}
  0x62   :  { %s1518_s11 = scalar_lea.vmem %s35_s26, 128  ;;  %p1523_p2 = scmp.lt.s32.totalorder %s35_s26, %s35_s26 }
  0x63   :  { %p1519_p1 = scmp.ne.s32.totalorder %s35_s26, %s1518_s11  ;;  %p1524_p3 = scmp.lt.s32.totalorder %s1518_s11, %s1518_s11 }
  0x65   :  { %p1525_p4 = por %p1524_p3, %p1523_p2 }
  0x67   :  { %p1526_p5 = pnand %p1525_p4, %p1519_p1 }
  0x69   :  { %1529 = shalt.err (!%p1526_p5)
}
  0x6a   :  { %40 = dma.hbm_to_vmem [thread:$0]  %s2240_s1, 128, %s35_s26, [#allocation3], %s1679_s19, %s1679_s19, %s1680_s28  }
  0x6b   :  { %s1530_s9 = scalar_lea.hbm %s2243_s4, 16 }
  0x6c   :  { %p1531_p6 = scmp.ne.s32.totalorder %s2243_s4, %s1530_s9  ;;  %p1534_p7 = scmp.lt.u32.totalorder %s1530_s9, %s2243_s4 }
  0x6e   :  { %p1536_p8 = pnand %p1534_p7, %p1531_p6 }
  0x70   :  { %1539 = shalt.err (!%p1536_p8)
}
  0x71   :  { %s1540_s5 = scalar_lea.vmem %s60_s20, 16  ;;  %s1544_s17 = scalar_lea.vmem %s60_s20, 32 }
  0x72   :  { %p1541_p9 = scmp.ne.s32.totalorder %s60_s20, %s1540_s5  ;;  %p1545_p10 = scmp.lt.s32.totalorder %s60_s20, %s60_s20 }
  0x73   :  { %p1546_p11 = scmp.lt.s32.totalorder %s1544_s17, %s1540_s5 }
  0x75   :  { %p1547_p12 = por %p1546_p11, %p1545_p10 }
  0x77   :  { %p1548_p13 = pnand %p1547_p12, %p1541_p9 }
  0x79   :  { %1551 = shalt.err (!%p1548_p13)
}
  0x7a   :  { %62 = dma.hbm_to_vmem [thread:$0]  %s2243_s4, 16, %s60_s20, [#allocation6]  }
  0x7b   :  { %s1685_s28 = smov [#allocation10]   ;;  %s1686_s3 = smov [#allocation13]  }
  0x7c   :  { %s81_s26 = sshll.u32 %s1685_s28, 4  ;;  %s101_s30 = sshll.u32 %s1686_s3, 4  ;;  %s82_s26 = int_to_ptr.vmem [resolvable:$true] %s81_s26  ;;  %s102_s30 = int_to_ptr.vmem [resolvable:$true] %s101_s30 }
  0x7d   :  { %s1552_s11 = scalar_lea.hbm %s2245_s6, 16 }
  0x7e   :  { %p1553_p0 = scmp.ne.s32.totalorder %s2245_s6, %s1552_s11  ;;  %p1556_p1 = scmp.lt.u32.totalorder %s1552_s11, %s2245_s6 }
  0x80   :  { %p1558_p2 = pnand %p1556_p1, %p1553_p0 }
  0x82   :  { %1561 = shalt.err (!%p1558_p2)
}
  0x83   :  { %s1562_s4 = scalar_lea.vmem %s82_s26, 16  ;;  %s1566_s20 = scalar_lea.vmem %s82_s26, 32 }
  0x84   :  { %p1563_p3 = scmp.ne.s32.totalorder %s82_s26, %s1562_s4  ;;  %p1567_p4 = scmp.lt.s32.totalorder %s82_s26, %s82_s26 }
  0x85   :  { %p1568_p5 = scmp.lt.s32.totalorder %s1566_s20, %s1562_s4 }
  0x87   :  { %p1569_p6 = por %p1568_p5, %p1567_p4 }
  0x89   :  { %p1570_p7 = pnand %p1569_p6, %p1563_p3 }
  0x8b   :  { %1573 = shalt.err (!%p1570_p7)
}
  0x8c   :  { %84 = dma.hbm_to_vmem [thread:$0]  %s2245_s6, 16, %s82_s26, [#allocation9]  }
  0x8d   :  { %s1574_s27 = scalar_lea.hbm %s2247_s8, 16 }
  0x8e   :  { %p1575_p8 = scmp.ne.s32.totalorder %s2247_s8, %s1574_s27  ;;  %p1578_p9 = scmp.lt.u32.totalorder %s1574_s27, %s2247_s8 }
  0x90   :  { %p1580_p10 = pnand %p1578_p9, %p1575_p8 }
  0x92   :  { %1583 = shalt.err (!%p1580_p10)
}
  0x93   :  { %s1584_s28 = scalar_lea.vmem %s102_s30, 16  ;;  %s1588_s3 = scalar_lea.vmem %s102_s30, 32 }
  0x94   :  { %p1585_p11 = scmp.ne.s32.totalorder %s102_s30, %s1584_s28  ;;  %p1589_p12 = scmp.lt.s32.totalorder %s102_s30, %s102_s30 }
  0x95   :  { %p1590_p13 = scmp.lt.s32.totalorder %s1588_s3, %s1584_s28 }
  0x97   :  { %p1591_p0 = por %p1590_p13, %p1589_p12 }
  0x99   :  { %p1592_p1 = pnand %p1591_p0, %p1585_p11 }
  0x9b   :  { %1595 = shalt.err (!%p1592_p1)
}
  0x9c   :  { %104 = dma.hbm_to_vmem [thread:$0]  %s2247_s8, 16, %s102_s30, [#allocation12]  }
  0x9d   :  { %s1687_s18 = smov [#allocation16]   ;;  %s1688_s11 = smov [#allocation19]  }
  0x9e   :  { %s123_s21 = sshll.u32 %s1687_s18, 4  ;;  %s143_s16 = sshll.u32 %s1688_s11, 4  ;;  %s124_s21 = int_to_ptr.vmem [resolvable:$true] %s123_s21  ;;  %s144_s16 = int_to_ptr.vmem [resolvable:$true] %s143_s16 }
  0x9f   :  { %s1596_s24 = scalar_lea.hbm %s2249_s10, 16 }
  0xa0   :  { %p1597_p2 = scmp.ne.s32.totalorder %s2249_s10, %s1596_s24  ;;  %p1600_p3 = scmp.lt.u32.totalorder %s1596_s24, %s2249_s10 }
  0xa2   :  { %p1602_p4 = pnand %p1600_p3, %p1597_p2 }
  0xa4   :  { %1605 = shalt.err (!%p1602_p4)
}
  0xa5   :  { %s1606_s8 = scalar_lea.vmem %s124_s21, 16  ;;  %s1610_s30 = scalar_lea.vmem %s124_s21, 32 }
  0xa6   :  { %p1607_p5 = scmp.ne.s32.totalorder %s124_s21, %s1606_s8  ;;  %p1611_p6 = scmp.lt.s32.totalorder %s124_s21, %s124_s21 }
  0xa7   :  { %p1612_p7 = scmp.lt.s32.totalorder %s1610_s30, %s1606_s8 }
  0xa9   :  { %p1613_p8 = por %p1612_p7, %p1611_p6 }
  0xab   :  { %p1614_p9 = pnand %p1613_p8, %p1607_p5 }
  0xad   :  { %1617 = shalt.err (!%p1614_p9)
}
  0xae   :  { %126 = dma.hbm_to_vmem [thread:$0]  %s2249_s10, 16, %s124_s21, [#allocation15]  }
  0xaf   :  { %s1618_s17 = scalar_lea.hbm %s2251_s12, 16 }
  0xb0   :  { %p1619_p10 = scmp.ne.s32.totalorder %s2251_s12, %s1618_s17  ;;  %p1622_p11 = scmp.lt.u32.totalorder %s1618_s17, %s2251_s12 }
  0xb2   :  { %p1624_p12 = pnand %p1622_p11, %p1619_p10 }
  0xb4   :  { %1627 = shalt.err (!%p1624_p12)
}
  0xb5   :  { %s1628_s6 = scalar_lea.vmem %s144_s16, 16  ;;  %s1632_s26 = scalar_lea.vmem %s144_s16, 32 }
  0xb6   :  { %p1629_p13 = scmp.ne.s32.totalorder %s144_s16, %s1628_s6  ;;  %p1633_p0 = scmp.lt.s32.totalorder %s144_s16, %s144_s16 }
  0xb7   :  { %p1634_p1 = scmp.lt.s32.totalorder %s1632_s26, %s1628_s6 }
  0xb9   :  { %p1635_p2 = por %p1634_p1, %p1633_p0 }
  0xbb   :  { %p1636_p3 = pnand %p1635_p2, %p1629_p13 }
  0xbd   :  { %1639 = shalt.err (!%p1636_p3)
}
  0xbe   :  { %146 = dma.hbm_to_vmem [thread:$0]  %s2251_s12, 16, %s144_s16, [#allocation18]  }
  0xbf   :  { %1662 = dma.done.wait [#allocation3], 128  }
  0xc0   :  { %1663 = vsyncadd [#allocation3], 4294967168 }
  0xc1   :  { %1664 = dma.done.wait [#allocation6], 32  }
  0xc2   :  { %1665 = vsyncadd [#allocation6], 4294967264 }
  0xc3   :  { %1666 = dma.done.wait [#allocation9], 272  }
  0xc4   :  { %1667 = vsyncadd [#allocation9], 4294967024 }
  0xc5   :  { %1668 = dma.done.wait [#allocation12], 32  }
  0xc6   :  { %1669 = vsyncadd [#allocation12], 4294967264 }
  0xc7   :  { %1670 = dma.done.wait [#allocation15], 528  }
  0xc8   :  { %1671 = vsyncadd [#allocation15], 4294966768 }
  0xc9   :  { %1672 = dma.done.wait [#allocation18], 32  }
  0xca   :  { %1673 = vsyncadd [#allocation18], 4294967264  ;;  %v1313_v0 = vld [vmem:[#allocation2] sm:$0xff]   ;;  %v186_v2 = vld [vmem:[%s2239_s0 + $0x8] sm:$0xff]  ;;  %vm212_vm0 = vcmask 130048   ;;  %vm308_vm1 = vcmask 261120  }
  0xcb   :  { %v185_v1 = vld [vmem:[%s2239_s0] sm:$0xff]  ;;  %v187_v3 = vld [vmem:[%s2239_s0 + $0x10] sm:$0xff]  ;;  %1258 = vmatprep.subr.bf16.mxu0 %v1313_v0  ;;  %v188_v5 = vld [vmem:[%s2239_s0 + $0x18] sm:$0xff]  ;;  %vm519_vm2 = vcmask 523264  }
  0xcc   :  { %v193_v4 = vpack.c.bf16 %v186_v2, %v185_v1  ;;  %v189_v6 = vld [vmem:[%s2239_s0 + $0x20] sm:$0xff]  ;;  %v190_v7 = vld [vmem:[%s2239_s0 + $0x28] sm:$0xff]  ;;  %1259 = vmatpush3.bf16.msra.mxu0 %v1313_v0  ;;  %v194_v8 = vpack.c.bf16 %v188_v5, %v187_v3  ;;  %v191_v10 = vld [vmem:[%s2239_s0 + $0x30] sm:$0xff] }
  0xcd   :  { %v195_v9 = vpack.c.bf16 %v190_v7, %v189_v6  ;;  %v192_v11 = vld [vmem:[%s2239_s0 + $0x38] sm:$0xff]  ;;  %v1314_v13 = vld [vmem:[#allocation8] sm:$0xff]   ;;  %v1201_v15 = vld [vmem:[%s2241_s2] ss:$0 sm:$0xff] }
  0xce   :  { %1260 = vmatprep.mubr.msk.bf16.mxu0 %vm212_vm0, %v193_v4  ;;  %v196_v12 = vpack.c.bf16 %v192_v11, %v191_v10  ;;  %1268 = vmatprep.subr.bf16.mxu0 %v1314_v13  ;;  %v1315_v14 = vld [vmem:[#allocation8 + $0x8] sm:$0xff]  }
  0xcf   :  { %1261 = vmatmul.mubr.msk.bf16.vlgmr.msra.gmra.mrb[0].mxu0 %vm212_vm0, %v194_v8 }
  0xd0   :  { %1264 = vmatprep.mubr.msk.bf16.mxu0 %vm212_vm0, %v195_v9  ;;  %1269 = vmatpush3.bf16.msra.mxu0 %v1314_v13 }
  0xd1   :  { %1270 = vmatprep.subr.bf16.mxu0 %v1315_v14 }
  0xd4   :  { %1271 = vmatpush3.bf16.msra.mxu0 %v1315_v14 }
  0xd7   :  { %1265 = vmatmul.mubr.msk.bf16.gmra.mrb[4].mxu0 %vm212_vm0, %v196_v12 }
 0x1a2   :  { %v1262_v16 = vpop.f32.mrb[0].mxu0 }
 0x1a3   :  { %v268_v17 = vadd.f32 %v1262_v16, %v1201_v15  ;;  %v259_v18 = vpop.f32.mrb[1].mxu0 }
 0x1a4   :  { %v260_v19 = vadd.f32 %v1201_v15, %v259_v18  ;;  %v1263_v20 = vpop.f32.mrb[2].mxu0 }
 0x1a5   :  { %v292_v21 = vmul.f32 0.2, %v268_v17  ;;  %v271_v22 = vadd.f32 %v1263_v20, %v1201_v15  ;;  %v262_v23 = vpop.f32.mrb[3].mxu0 }
 0x1a6   :  { %v290_v24 = vmul.f32 0.2, %v260_v19  ;;  %v263_v25 = vadd.f32 %v1201_v15, %v262_v23 }
 0x1a7   :  { %v1945_v26 = vmax.f32 %v268_v17, %v292_v21  ;;  %v293_v27 = vmul.f32 0.2, %v271_v22 }
 0x1a8   :  { %v1947_v28 = vmax.f32 %v260_v19, %v290_v24  ;;  %v291_v29 = vmul.f32 0.2, %v263_v25 }
 0x1a9   :  { %v1949_v30 = vmax.f32 %v271_v22, %v293_v27  ;;  %v312_v34 = vsel %vm308_vm1, %v1945_v26, 0.0  ;;  %v332_v35 = vmul.f32 %v1945_v26, %v1945_v26 }
 0x1aa   :  { %v330_v31 = vmul.f32 %v1947_v28, %v1947_v28  ;;  %v1953_v32 = vmax.f32 %v263_v25, %v291_v29  ;;  %v1266_v33 = vpop.f32.mrb[4].mxu0  ;;  %v309_v38 = vsel %vm308_vm1, %v1947_v28, 0.0 }
 0x1ab   :  { %v284_v36 = vadd.f32 %v1266_v33, %v1201_v15  ;;  %v275_v37 = vpop.f32.mrb[5].mxu0  ;;  %v333_v43 = vmul.f32 %v1949_v30, %v1949_v30  ;;  %v341_v55 = vsel %vm308_vm1, %v332_v35, 0.0  ;;  %v314_v56 = vsel %vm308_vm1, %v1949_v30, 0.0 }
 0x1ac   :  { %v310_v39 = vsel %vm308_vm1, %v1953_v32, 0.0  ;;  %v331_v40 = vmul.f32 %v1953_v32, %v1953_v32  ;;  %v276_v41 = vadd.f32 %v1201_v15, %v275_v37  ;;  %v1267_v42 = vpop.f32.mrb[6].mxu0  ;;  %v338_v48 = vsel %vm308_vm1, %v330_v31, 0.0 }
 0x1ad   :  { %v311_v44 = vadd.f32 %v310_v39, %v309_v38  ;;  %v296_v45 = vmul.f32 0.2, %v284_v36  ;;  %v287_v46 = vadd.f32 %v1267_v42, %v1201_v15  ;;  %v278_v47 = vpop.f32.mrb[7].mxu0  ;;  %v343_v62 = vsel %vm308_vm1, %v333_v43, 0.0 }
 0x1ae   :  { %v339_v49 = vsel %vm308_vm1, %v331_v40, 0.0  ;;  %v294_v50 = vmul.f32 0.2, %v276_v41  ;;  %v279_v51 = vadd.f32 %v1201_v15, %v278_v47 }
 0x1af   :  { %v313_v52 = vadd.f32 %v312_v34, %v311_v44  ;;  %v340_v53 = vadd.f32 %v339_v49, %v338_v48  ;;  %v297_v54 = vmul.f32 0.2, %v287_v46  ;;  %v304_v60 = vmax.f32 %v284_v36, %v296_v45 }
 0x1b0   :  { %v1972_v57 = vmax.f32 %v276_v41, %v294_v50  ;;  %v295_v58 = vmul.f32 0.2, %v279_v51  ;;  %v370_v44 = vlaneseq  ;;  %v307_v50 = vld [vmem:[#allocation7] sm:$0x1] }
 0x1b1   :  { %v342_v59 = vadd.f32 %v341_v55, %v340_v53  ;;  %v315_v61 = vadd.f32 %v314_v56, %v313_v52  ;;  %v305_v4 = vmax.f32 %v287_v46, %v297_v54  ;;  %v336_v7 = vmul.f32 %v304_v60, %v304_v60  ;;  %v306_v46 = vld [vmem:[#allocation5] sm:$0x1] }
 0x1b2   :  { %v316_v63 = vsel %vm308_vm1, %v1972_v57, 0.0  ;;  %v334_v0 = vmul.f32 %v1972_v57, %v1972_v57  ;;  %v303_v1 = vmax.f32 %v279_v51, %v295_v58  ;;  %v320_v11 = vsel %vm308_vm1, %v304_v60, 0.0 }
 0x1b3   :  { %v317_v2 = vadd.f32 %v316_v63, %v315_v61  ;;  %v344_v3 = vadd.f32 %v343_v62, %v342_v59  ;;  %v337_v12 = vmul.f32 %v305_v4, %v305_v4  ;;  %v322_v15 = vsel %vm308_vm1, %v305_v4, 0.0 }
 0x1b4   :  { %v345_v5 = vsel %vm308_vm1, %v334_v0, 0.0  ;;  %v318_v6 = vsel %vm308_vm1, %v303_v1, 0.0  ;;  %v335_v10 = vmul.f32 %v303_v1, %v303_v1  ;;  %v349_v17 = vsel %vm308_vm1, %v336_v7, 0.0 }
 0x1b5   :  { %v346_v8 = vadd.f32 %v345_v5, %v344_v3  ;;  %v319_v9 = vadd.f32 %v318_v6, %v317_v2  ;;  %v351_v20 = vsel %vm308_vm1, %v337_v12, 0.0  ;;  %v1986_v45 = vshrl.u32 %v370_v44, 7 }
 0x1b6   :  { %v347_v14 = vsel %vm308_vm1, %v335_v10, 0.0 }
 0x1b7   :  { %v321_v13 = vadd.f32 %v320_v11, %v319_v9  ;;  %v348_v16 = vadd.f32 %v347_v14, %v346_v8  ;;  %v1989_v47 = vsub.s32 0, %v1986_v45  ;;  %v1207_v11 = vld [vmem:[#allocation10] ss:$0 sm:$0xff] }
 0x1b9   :  { %v323_v18 = vadd.f32 %v322_v15, %v321_v13  ;;  %v350_v19 = vadd.f32 %v349_v17, %v348_v16 }
 0x1bb   :  { %v324_v21 = vrot.slane %v323_v18, 4  ;;  %v352_v22 = vadd.f32 %v351_v20, %v350_v19 }
 0x1bd   :  { %v325_v23 = vadd.f32 %v324_v21, %v323_v18  ;;  %v353_v24 = vrot.slane %v352_v22, 4 }
 0x1bf   :  { %v326_v25 = vrot.slane %v325_v23, 2  ;;  %v354_v27 = vadd.f32 %v353_v24, %v352_v22 }
 0x1c1   :  { %v327_v29 = vadd.f32 %v326_v25, %v325_v23  ;;  %v355_v31 = vrot.slane %v354_v27, 2 }
 0x1c3   :  { %v328_v33 = vrot.slane %v327_v29, 1  ;;  %v356_v34 = vadd.f32 %v355_v31, %v354_v27 }
 0x1c5   :  { %v329_v35 = vadd.f32 %v328_v33, %v327_v29  ;;  %v357_v36 = vrot.slane %v356_v34, 1 }
 0x1c7   :  { %v359_v37 = vmul.f32 0.015625, %v329_v35  ;;  %v358_v38 = vadd.f32 %v357_v36, %v356_v34 }
 0x1c9   :  { %v361_v39 = vmul.f32 %v359_v37, %v359_v37  ;;  %v360_v40 = vmul.f32 0.015625, %v358_v38 }
 0x1cb   :  { %v362_v41 = vsub.f32 %v360_v40, %v361_v39 }
 0x1cd   :  { %v363_v42 = vmax.f32 %v362_v41, 0.0 }
 0x1cf   :  { %v364_v43 = vadd.f32 1e-05, %v363_v42 }
 0x1d1   :  { %1344 = vrsqrt.f32 %v364_v43 }
 0x1db   :  { %v1345_v48 = vpop.eup %1344 }
 0x1dc   :  { %v366_v49 = vmul.f32 %v1345_v48, %v306_v46 }
 0x1de   :  { %v367_v51 = vmul.f32 %v366_v49, %v359_v37  ;;  %v373_v52 = vrot.slane %v366_v49, %v1989_v47 }
 0x1e0   :  { %v368_v53 = vsub.f32 %v307_v50, %v367_v51  ;;  %v380_v54 = vmul.f32 %v373_v52, %v303_v1  ;;  %v375_v55 = vmul.f32 %v373_v52, %v1947_v28  ;;  %v376_v56 = vmul.f32 %v373_v52, %v1953_v32 }
 0x1e1   :  { %v377_v58 = vmul.f32 %v373_v52, %v1945_v26  ;;  %v378_v59 = vmul.f32 %v373_v52, %v1949_v30  ;;  %v379_v61 = vmul.f32 %v373_v52, %v1972_v57  ;;  %v381_v62 = vmul.f32 %v373_v52, %v304_v60  ;;  %v1316_v30 = vld [vmem:[#allocation14] sm:$0xff]   ;;  %v1317_v57 = vld [vmem:[#allocation14 + $0x8] sm:$0xff]   ;;  %v1318_v60 = vld [vmem:[#allocation14 + $0x10] sm:$0xff]  }
 0x1e2   :  { %v387_v63 = vrot.slane %v368_v53, %v1989_v47  ;;  %v382_v0 = vmul.f32 %v373_v52, %v305_v4  ;;  %1280 = vmatprep.subr.bf16.mxu0 %v1316_v30  ;;  %v1319_v4 = vld [vmem:[#allocation14 + $0x18] sm:$0xff]  }
 0x1e4   :  { %v394_v2 = vadd.f32 %v387_v63, %v380_v54  ;;  %v389_v3 = vadd.f32 %v387_v63, %v375_v55  ;;  %v390_v5 = vadd.f32 %v387_v63, %v376_v56  ;;  %v391_v6 = vadd.f32 %v387_v63, %v377_v58 }
 0x1e5   :  { %v392_v7 = vadd.f32 %v387_v63, %v378_v59  ;;  %v393_v1 = vadd.f32 %v387_v63, %v379_v61  ;;  %v395_v8 = vadd.f32 %v387_v63, %v381_v62  ;;  %v396_v28 = vadd.f32 %v387_v63, %v382_v0 }
 0x1e6   :  { %v397_v9 = vpack.c.bf16 %v390_v5, %v389_v3 }
 0x1e7   :  { %v398_v32 = vpack.c.bf16 %v392_v7, %v391_v6  ;;  %v399_v10 = vpack.c.bf16 %v394_v2, %v393_v1  ;;  %v400_v26 = vpack.c.bf16 %v396_v28, %v395_v8 }
 0x1e8   :  { %1272 = vmatprep.mubr.msk.bf16.mxu0 %vm308_vm1, %v397_v9 }
 0x1e9   :  { %1273 = vmatmul.mubr.msk.bf16.vlgmr.msra.gmra.mrb[8].mxu0 %vm308_vm1, %v398_v32 }
 0x1ea   :  { %1276 = vmatprep.mubr.msk.bf16.mxu0 %vm308_vm1, %v399_v10  ;;  %1281 = vmatpush3.bf16.msra.mxu0 %v1316_v30 }
 0x1eb   :  { %1282 = vmatprep.subr.bf16.mxu0 %v1317_v57 }
 0x1ee   :  { %1283 = vmatpush3.bf16.msra.mxu0 %v1317_v57 }
 0x1ef   :  { %1284 = vmatprep.subr.bf16.mxu0 %v1318_v60 }
 0x1f1   :  { %1277 = vmatmul.mubr.msk.bf16.gmra.mrb[12].mxu0 %vm308_vm1, %v400_v26 }
 0x1f2   :  { %1285 = vmatpush3.bf16.msra.mxu0 %v1318_v60 }
 0x1f3   :  { %1286 = vmatprep.subr.bf16.mxu0 %v1319_v4 }
 0x1f6   :  { %1287 = vmatpush3.bf16.msra.mxu0 %v1319_v4 }
 0x2bc   :  { %v1274_v12 = vpop.f32.mrb[8].mxu0 }
 0x2bd   :  { %v479_v13 = vadd.f32 %v1274_v12, %v1207_v11  ;;  %v470_v14 = vpop.f32.mrb[9].mxu0 }
 0x2be   :  { %v471_v15 = vadd.f32 %v1207_v11, %v470_v14  ;;  %v1275_v16 = vpop.f32.mrb[10].mxu0 }
 0x2bf   :  { %v503_v17 = vmul.f32 0.2, %v479_v13  ;;  %v482_v18 = vadd.f32 %v1275_v16, %v1207_v11  ;;  %v473_v19 = vpop.f32.mrb[11].mxu0 }
 0x2c0   :  { %v501_v20 = vmul.f32 0.2, %v471_v15  ;;  %v474_v21 = vadd.f32 %v1207_v11, %v473_v19 }
 0x2c1   :  { %v2002_v22 = vmax.f32 %v479_v13, %v503_v17  ;;  %v504_v23 = vmul.f32 0.2, %v482_v18 }
 0x2c2   :  { %v2004_v24 = vmax.f32 %v471_v15, %v501_v20  ;;  %v502_v25 = vmul.f32 0.2, %v474_v21 }
 0x2c3   :  { %v2006_v27 = vmax.f32 %v482_v18, %v504_v23  ;;  %v523_v34 = vsel %vm519_vm2, %v2002_v22, 0.0  ;;  %v543_v35 = vmul.f32 %v2002_v22, %v2002_v22 }
 0x2c4   :  { %v541_v29 = vmul.f32 %v2004_v24, %v2004_v24  ;;  %v2010_v31 = vmax.f32 %v474_v21, %v502_v25  ;;  %v1278_v33 = vpop.f32.mrb[12].mxu0  ;;  %v520_v38 = vsel %vm519_vm2, %v2004_v24, 0.0 }
 0x2c5   :  { %v495_v36 = vadd.f32 %v1278_v33, %v1207_v11  ;;  %v486_v37 = vpop.f32.mrb[13].mxu0  ;;  %v544_v43 = vmul.f32 %v2006_v27, %v2006_v27  ;;  %v552_v58 = vsel %vm519_vm2, %v543_v35, 0.0  ;;  %v525_v59 = vsel %vm519_vm2, %v2006_v27, 0.0 }
 0x2c6   :  { %v521_v39 = vsel %vm519_vm2, %v2010_v31, 0.0  ;;  %v542_v40 = vmul.f32 %v2010_v31, %v2010_v31  ;;  %v487_v41 = vadd.f32 %v1207_v11, %v486_v37  ;;  %v1279_v42 = vpop.f32.mrb[14].mxu0  ;;  %v549_v50 = vsel %vm519_vm2, %v541_v29, 0.0 }
 0x2c7   :  { %v522_v44 = vadd.f32 %v521_v39, %v520_v38  ;;  %v507_v46 = vmul.f32 0.2, %v495_v36  ;;  %v498_v48 = vadd.f32 %v1279_v42, %v1207_v11  ;;  %v489_v49 = vpop.f32.mrb[15].mxu0  ;;  %v554_v3 = vsel %vm519_vm2, %v544_v43, 0.0 }
 0x2c8   :  { %v550_v51 = vsel %vm519_vm2, %v542_v40, 0.0  ;;  %v505_v52 = vmul.f32 0.2, %v487_v41  ;;  %v490_v53 = vadd.f32 %v1207_v11, %v489_v49 }
 0x2c9   :  { %v524_v54 = vadd.f32 %v523_v34, %v522_v44  ;;  %v551_v55 = vadd.f32 %v550_v51, %v549_v50  ;;  %v508_v56 = vmul.f32 0.2, %v498_v48  ;;  %v515_v0 = vmax.f32 %v495_v36, %v507_v46  ;;  %v518_v51 = vld [vmem:[#allocation13] sm:$0x1] }
 0x2ca   :  { %v513_v61 = vmax.f32 %v487_v41, %v505_v52  ;;  %v506_v62 = vmul.f32 0.2, %v490_v53 }
 0x2cb   :  { %v553_v63 = vadd.f32 %v552_v58, %v551_v55  ;;  %v526_v2 = vadd.f32 %v525_v59, %v524_v54  ;;  %v516_v28 = vmax.f32 %v498_v48, %v508_v56  ;;  %v547_v10 = vmul.f32 %v515_v0, %v515_v0  ;;  %v517_v48 = vld [vmem:[#allocation11] sm:$0x1] }
 0x2cc   :  { %v527_v5 = vsel %vm519_vm2, %v513_v61, 0.0  ;;  %v545_v6 = vmul.f32 %v513_v61, %v513_v61  ;;  %v514_v7 = vmax.f32 %v490_v53, %v506_v62  ;;  %v531_v60 = vsel %vm519_vm2, %v515_v0, 0.0 }
 0x2cd   :  { %v528_v1 = vadd.f32 %v527_v5, %v526_v2  ;;  %v555_v8 = vadd.f32 %v554_v3, %v553_v63  ;;  %v548_v4 = vmul.f32 %v516_v28, %v516_v28  ;;  %v533_v13 = vsel %vm519_vm2, %v516_v28, 0.0 }
 0x2ce   :  { %v556_v9 = vsel %vm519_vm2, %v545_v6, 0.0  ;;  %v529_v32 = vsel %vm519_vm2, %v514_v7, 0.0  ;;  %v546_v57 = vmul.f32 %v514_v7, %v514_v7  ;;  %v560_v15 = vsel %vm519_vm2, %v547_v10, 0.0 }
 0x2cf   :  { %v557_v26 = vadd.f32 %v556_v9, %v555_v8  ;;  %v530_v30 = vadd.f32 %v529_v32, %v528_v1  ;;  %v562_v18 = vsel %vm519_vm2, %v548_v4, 0.0  ;;  %v1329_v4 = vld [vmem:[%s2252_s13 + $0x34] ss:$8 sps:$4 sm:$0xff]  }
 0x2d0   :  { %v558_v12 = vsel %vm519_vm2, %v546_v57, 0.0 }
 0x2d1   :  { %v532_v11 = vadd.f32 %v531_v60, %v530_v30  ;;  %v559_v14 = vadd.f32 %v558_v12, %v557_v26  ;;  %v1328_v60 = vld [vmem:[%s2252_s13 + $0x20] ss:$8 sps:$4 sm:$0xff]   ;;  %v1332_v12 = vld [vmem:[%s2252_s13 + $0x44] ss:$8 sps:$4 sm:$0xff]  }
 0x2d3   :  { %v534_v16 = vadd.f32 %v533_v13, %v532_v11  ;;  %v561_v17 = vadd.f32 %v560_v15, %v559_v14  ;;  %v1331_v11 = vld [vmem:[%s2252_s13 + $0x30] ss:$8 sps:$4 sm:$0xff]   ;;  %v1334_v13 = vld [vmem:[%s2252_s13 + $0x40] ss:$8 sps:$4 sm:$0xff]   ;;  %v1335_v14 = vld [vmem:[%s2252_s13 + $0x54] ss:$8 sps:$4 sm:$0xff]  }
 0x2d4   :  { %v1337_v15 = vld [vmem:[%s2252_s13 + $0x50] ss:$8 sps:$4 sm:$0xff]  }
 0x2d5   :  { %v535_v19 = vrot.slane %v534_v16, 4  ;;  %v563_v20 = vadd.f32 %v562_v18, %v561_v17  ;;  %v1340_v17 = vld [vmem:[%s2252_s13 + $0x60] ss:$8 sps:$4 sm:$0xff]   ;;  %v1341_v18 = vld [vmem:[%s2252_s13 + $0x74] ss:$8 sps:$4 sm:$0xff]  }
 0x2d7   :  { %v536_v21 = vadd.f32 %v535_v19, %v534_v16  ;;  %v564_v23 = vrot.slane %v563_v20, 4  ;;  %v1338_v16 = vld [vmem:[%s2252_s13 + $0x64] ss:$8 sps:$4 sm:$0xff]   ;;  %v1343_v19 = vld [vmem:[%s2252_s13 + $0x70] ss:$8 sps:$4 sm:$0xff]  }
 0x2d9   :  { %v537_v25 = vrot.slane %v536_v21, 2  ;;  %v565_v29 = vadd.f32 %v564_v23, %v563_v20  ;;  %v1689_v20 = vmov 0  }
 0x2da   :  { %962 = vmatprep.mubr.bf16.mxu1 %v1689_v20 }
 0x2db   :  { %v538_v33 = vadd.f32 %v537_v25, %v536_v21  ;;  %v566_v34 = vrot.slane %v565_v29, 2  ;;  %v1214_v21 = vld [vmem:[#allocation16] ss:$0 sm:$0xff] }
 0x2dd   :  { %v539_v35 = vrot.slane %v538_v33, 1  ;;  %v567_v36 = vadd.f32 %v566_v34, %v565_v29 }
 0x2df   :  { %v540_v37 = vadd.f32 %v539_v35, %v538_v33  ;;  %v568_v38 = vrot.slane %v567_v36, 1 }
 0x2e1   :  { %v570_v39 = vmul.f32 0.015625, %v540_v37  ;;  %v569_v40 = vadd.f32 %v568_v38, %v567_v36 }
 0x2e3   :  { %v572_v41 = vmul.f32 %v570_v39, %v570_v39  ;;  %v571_v42 = vmul.f32 0.015625, %v569_v40 }
 0x2e5   :  { %v573_v43 = vsub.f32 %v571_v42, %v572_v41 }
 0x2e7   :  { %v574_v44 = vmax.f32 %v573_v43, 0.0 }
 0x2e9   :  { %v575_v46 = vadd.f32 1e-05, %v574_v44 }
 0x2eb   :  { %1346 = vrsqrt.f32 %v575_v46 }
 0x2f5   :  { %v1347_v49 = vpop.eup %1346 }
 0x2f6   :  { %v577_v50 = vmul.f32 %v1347_v49, %v517_v48 }
 0x2f8   :  { %v578_v52 = vmul.f32 %v577_v50, %v570_v39  ;;  %v584_v53 = vrot.slane %v577_v50, %v1989_v47 }
 0x2fa   :  { %v579_v54 = vsub.f32 %v518_v51, %v578_v52  ;;  %v591_v55 = vmul.f32 %v584_v53, %v514_v7  ;;  %v586_v56 = vmul.f32 %v584_v53, %v2004_v24  ;;  %v587_v58 = vmul.f32 %v584_v53, %v2010_v31 }
 0x2fb   :  { %v588_v59 = vmul.f32 %v584_v53, %v2002_v22  ;;  %v589_v62 = vmul.f32 %v584_v53, %v2006_v27  ;;  %v590_v63 = vmul.f32 %v584_v53, %v513_v61  ;;  %v592_v2 = vmul.f32 %v584_v53, %v515_v0  ;;  %v1320_v22 = vld [vmem:[%s2252_s13 + $0x4] ss:$8 sps:$4 sm:$0xff]   ;;  %v1322_v27 = vld [vmem:[%s2252_s13] ss:$8 sps:$4 sm:$0xff]   ;;  %v1323_v61 = vld [vmem:[%s2252_s13 + $0x14] ss:$8 sps:$4 sm:$0xff]  }
 0x2fc   :  { %v598_v3 = vrot.slane %v579_v54, %v1989_v47  ;;  %v593_v5 = vmul.f32 %v584_v53, %v516_v28  ;;  %930 = vmatprep.subr.bf16.mxu1 %v1320_v22  ;;  %v1325_v0 = vld [vmem:[%s2252_s13 + $0x10] ss:$8 sps:$4 sm:$0xff]   ;;  %v1326_v28 = vld [vmem:[%s2252_s13 + $0x24] ss:$8 sps:$4 sm:$0xff]  }
 0x2fd   :  { %931 = vmatpush1.bf16.msra.mxu1 %v1322_v27 }
 0x2fe   :  { %v605_v6 = vadd.f32 %v598_v3, %v591_v55  ;;  %v600_v1 = vadd.f32 %v598_v3, %v586_v56  ;;  %v601_v8 = vadd.f32 %v598_v3, %v587_v58  ;;  %v602_v9 = vadd.f32 %v598_v3, %v588_v59  ;;  %932 = vmatprep.subr.bf16.mxu1 %v1323_v61 }
 0x2ff   :  { %v603_v32 = vadd.f32 %v598_v3, %v589_v62  ;;  %v604_v10 = vadd.f32 %v598_v3, %v590_v63  ;;  %v606_v7 = vadd.f32 %v598_v3, %v592_v2  ;;  %v607_v26 = vadd.f32 %v598_v3, %v593_v5 }
 0x300   :  { %v608_v24 = vpack.c.bf16 %v601_v8, %v600_v1 }
 0x301   :  { %v609_v30 = vpack.c.bf16 %v603_v32, %v602_v9  ;;  %v610_v31 = vpack.c.bf16 %v605_v6, %v604_v10  ;;  %v611_v57 = vpack.c.bf16 %v607_v26, %v606_v7  ;;  %933 = vmatpush1.bf16.msra.mxu1 %v1325_v0 }
 0x302   :  { %1288 = vmatprep.mubr.msk.bf16.mxu0 %vm519_vm2, %v608_v24  ;;  %934 = vmatprep.subr.bf16.mxu1 %v1326_v28 }
 0x303   :  { %1289 = vmatmul.mubr.msk.bf16.vlgmr.msra.gmra.mrb[16].mxu0 %vm519_vm2, %v609_v30 }
 0x304   :  { %1292 = vmatprep.mubr.msk.bf16.mxu0 %vm519_vm2, %v610_v31 }
 0x305   :  { %935 = vmatpush1.bf16.msra.mxu1 %v1328_v60 }
 0x306   :  { %936 = vmatprep.subr.bf16.mxu1 %v1329_v4 }
 0x309   :  { %937 = vmatpush1.bf16.msra.mxu1 %v1331_v11 }
 0x30a   :  { %938 = vmatprep.subr.bf16.mxu1 %v1332_v12 }
 0x30b   :  { %1293 = vmatmul.mubr.msk.bf16.gmra.mrb[20].mxu0 %vm519_vm2, %v611_v57 }
 0x30d   :  { %939 = vmatpush1.bf16.msra.mxu1 %v1334_v13 }
 0x30e   :  { %940 = vmatprep.subr.bf16.mxu1 %v1335_v14 }
 0x311   :  { %941 = vmatpush1.bf16.msra.mxu1 %v1337_v15 }
 0x312   :  { %942 = vmatprep.subr.bf16.mxu1 %v1338_v16 }
 0x315   :  { %943 = vmatpush1.bf16.msra.mxu1 %v1340_v17 }
 0x316   :  { %944 = vmatprep.subr.bf16.mxu1 %v1341_v18 }
 0x319   :  { %945 = vmatpush1.bf16.msra.mxu1 %v1343_v19 }
 0x3d6   :  { %v1290_v23 = vpop.f32.mrb[16].mxu0 }
 0x3d7   :  { %v706_v25 = vadd.f32 %v1290_v23, %v1214_v21  ;;  %v697_v29 = vpop.f32.mrb[17].mxu0 }
 0x3d8   :  { %v698_v33 = vadd.f32 %v1214_v21, %v697_v29  ;;  %v1291_v34 = vpop.f32.mrb[18].mxu0 }
 0x3d9   :  { %v730_v35 = vmul.f32 0.2, %v706_v25  ;;  %v709_v36 = vadd.f32 %v1291_v34, %v1214_v21  ;;  %v700_v37 = vpop.f32.mrb[19].mxu0 }
 0x3da   :  { %v728_v38 = vmul.f32 0.2, %v698_v33  ;;  %v701_v39 = vadd.f32 %v1214_v21, %v700_v37 }
 0x3db   :  { %v731_v40 = vmul.f32 0.2, %v709_v36  ;;  %v2099_v43 = vmax.f32 %v706_v25, %v730_v35 }
 0x3dc   :  { %v2097_v41 = vmax.f32 %v698_v33, %v728_v38  ;;  %v729_v42 = vmul.f32 0.2, %v701_v39 }
 0x3dd   :  { %v2103_v48 = vmax.f32 %v709_v36, %v731_v40  ;;  %v761_v56 = vmul.f32 %v2099_v43, %v2099_v43 }
 0x3de   :  { %v2101_v44 = vmax.f32 %v701_v39, %v729_v42  ;;  %v1294_v46 = vpop.f32.mrb[20].mxu0  ;;  %v759_v51 = vmul.f32 %v2097_v41, %v2097_v41  ;;  %v744_v42 = vld [vmem:[#allocation17] sm:$0x1] }
 0x3df   :  { %v722_v49 = vadd.f32 %v1294_v46, %v1214_v21  ;;  %v713_v50 = vpop.f32.mrb[21].mxu0  ;;  %v762_v6 = vmul.f32 %v2103_v48, %v2103_v48 }
 0x3e0   :  { %v746_v52 = vadd.f32 %v2101_v44, %v2097_v41  ;;  %v760_v53 = vmul.f32 %v2101_v44, %v2101_v44  ;;  %v714_v54 = vadd.f32 %v1214_v21, %v713_v50  ;;  %v1295_v55 = vpop.f32.mrb[22].mxu0  ;;  %v745_v50 = vld [vmem:[#allocation19] sm:$0x1] }
 0x3e1   :  { %v734_v58 = vmul.f32 0.2, %v722_v49  ;;  %v725_v59 = vadd.f32 %v1295_v55, %v1214_v21  ;;  %v716_v62 = vpop.f32.mrb[23].mxu0 }
 0x3e2   :  { %v747_v63 = vadd.f32 %v746_v52, %v2099_v43  ;;  %v767_v2 = vadd.f32 %v760_v53, %v759_v51  ;;  %v732_v3 = vmul.f32 0.2, %v714_v54  ;;  %v717_v5 = vadd.f32 %v1214_v21, %v716_v62 }
 0x3e3   :  { %v735_v1 = vmul.f32 0.2, %v725_v59  ;;  %v742_v7 = vmax.f32 %v722_v49, %v734_v58 }
 0x3e4   :  { %v768_v8 = vadd.f32 %v767_v2, %v761_v56  ;;  %v740_v9 = vmax.f32 %v714_v54, %v732_v3  ;;  %v748_v32 = vadd.f32 %v747_v63, %v2103_v48  ;;  %v733_v10 = vmul.f32 0.2, %v717_v5 }
 0x3e5   :  { %v743_v22 = vmax.f32 %v725_v59, %v735_v1  ;;  %v765_v0 = vmul.f32 %v742_v7, %v742_v7 }
 0x3e6   :  { %v749_v26 = vadd.f32 %v748_v32, %v740_v9  ;;  %v763_v24 = vmul.f32 %v740_v9, %v740_v9  ;;  %v769_v30 = vadd.f32 %v768_v8, %v762_v6  ;;  %v741_v31 = vmax.f32 %v717_v5, %v733_v10 }
 0x3e7   :  { %v766_v4 = vmul.f32 %v743_v22, %v743_v22 }
 0x3e8   :  { %v770_v57 = vadd.f32 %v769_v30, %v763_v24  ;;  %v750_v27 = vadd.f32 %v749_v26, %v741_v31  ;;  %v764_v61 = vmul.f32 %v741_v31, %v741_v31 }
 0x3ea   :  { %v751_v28 = vadd.f32 %v750_v27, %v742_v7  ;;  %v771_v60 = vadd.f32 %v770_v57, %v764_v61 }
 0x3ec   :  { %v752_v11 = vadd.f32 %v751_v28, %v743_v22  ;;  %v772_v12 = vadd.f32 %v771_v60, %v765_v0 }
 0x3ee   :  { %v753_v13 = vrot.slane %v752_v11, 4  ;;  %v773_v14 = vadd.f32 %v772_v12, %v766_v4 }
 0x3f0   :  { %v754_v15 = vadd.f32 %v753_v13, %v752_v11  ;;  %v774_v16 = vrot.slane %v773_v14, 4 }
 0x3f2   :  { %v755_v17 = vrot.slane %v754_v15, 2  ;;  %v775_v18 = vadd.f32 %v774_v16, %v773_v14 }
 0x3f4   :  { %v756_v19 = vadd.f32 %v755_v17, %v754_v15  ;;  %v776_v21 = vrot.slane %v775_v18, 2 }
 0x3f6   :  { %v757_v23 = vrot.slane %v756_v19, 1  ;;  %v777_v25 = vadd.f32 %v776_v21, %v775_v18 }
 0x3f8   :  { %v758_v29 = vadd.f32 %v757_v23, %v756_v19  ;;  %v778_v33 = vrot.slane %v777_v25, 1 }
 0x3fa   :  { %v779_v34 = vadd.f32 %v778_v33, %v777_v25  ;;  %v780_v35 = vmul.f32 0.015625, %v758_v29 }
 0x3fc   :  { %v781_v36 = vmul.f32 0.015625, %v779_v34  ;;  %v782_v37 = vmul.f32 %v780_v35, %v780_v35 }
 0x3fe   :  { %v783_v38 = vsub.f32 %v781_v36, %v782_v37 }
 0x400   :  { %v784_v39 = vmax.f32 %v783_v38, 0.0 }
 0x402   :  { %v785_v40 = vadd.f32 1e-05, %v784_v39 }
 0x404   :  { %1348 = vrsqrt.f32 %v785_v40 }
 0x40e   :  { %v1349_v46 = vpop.eup %1348 }
 0x40f   :  { %v787_v49 = vmul.f32 %v1349_v46, %v744_v42 }
 0x411   :  { %v788_v51 = vmul.f32 %v787_v49, %v780_v35  ;;  %v794_v52 = vrot.slane %v787_v49, %v1989_v47 }
 0x413   :  { %v789_v53 = vsub.f32 %v745_v50, %v788_v51  ;;  %v801_v54 = vmul.f32 %v794_v52, %v741_v31  ;;  %v796_v55 = vmul.f32 %v794_v52, %v2097_v41  ;;  %v797_v56 = vmul.f32 %v794_v52, %v2101_v44 }
 0x414   :  { %v798_v58 = vmul.f32 %v794_v52, %v2099_v43  ;;  %v799_v59 = vmul.f32 %v794_v52, %v2103_v48  ;;  %v800_v62 = vmul.f32 %v794_v52, %v740_v9  ;;  %v802_v63 = vmul.f32 %v794_v52, %v742_v7  ;;  %v838_v43 = vld [vmem:[%s2253_s14] sm:$0x3]  ;;  %s1690_s14 = smov [#allocation20]  }
 0x415   :  { %v808_v2 = vrot.slane %v789_v53, %v1989_v47  ;;  %v803_v3 = vmul.f32 %v794_v52, %v743_v22  ;;  %v846_v48 = vsub.s32 1, %v1986_v45  ;;  %v843_v9 = vrot.slane %v838_v43, %v1989_v47  ;;  %s1184_s3 = sshll.u32 %s1690_s14, 4  ;;  %s1185_s3 = int_to_ptr.vmem [resolvable:$true] %s1184_s3 }
 0x416   :  { %s1640_s6 = scalar_lea.vmem %s1185_s3, 2048  ;;  %p1645_p5 = scmp.lt.s32.totalorder %s1185_s3, %s1185_s3 }
 0x417   :  { %v810_v5 = vadd.f32 %v808_v2, %v796_v55  ;;  %v811_v6 = vadd.f32 %v808_v2, %v797_v56  ;;  %v812_v1 = vadd.f32 %v808_v2, %v798_v58  ;;  %v813_v8 = vadd.f32 %v808_v2, %v799_v59  ;;  %p1641_p4 = scmp.ne.s32.totalorder %s1185_s3, %s1640_s6  ;;  %p1646_p6 = scmp.lt.s32.totalorder %s1640_s6, %s1640_s6 }
 0x418   :  { %v814_v32 = vadd.f32 %v808_v2, %v800_v62  ;;  %v815_v10 = vadd.f32 %v808_v2, %v801_v54  ;;  %v816_v26 = vadd.f32 %v808_v2, %v802_v63  ;;  %v817_v24 = vadd.f32 %v808_v2, %v803_v3 }
 0x419   :  { %v818_v41 = vpack.c.bf16 %v811_v6, %v810_v5  ;;  %v819_v30 = vpack.c.bf16 %v813_v8, %v812_v1  ;;  %v847_v7 = vrot.slane %v838_v43, %v846_v48  ;;  %p1647_p7 = por %p1646_p6, %p1645_p5 }
 0x41a   :  { %v820_v44 = vpack.c.bf16 %v815_v10, %v814_v32  ;;  %v821_v31 = vpack.c.bf16 %v817_v24, %v816_v26 }
 0x41b   :  { %963 = vmatmul.mubr.bf16.vlgmr.msra.gmra.mrb[0].mxu1 %v818_v41  ;;  %p1648_p8 = pnand %p1647_p7, %p1641_p4 }
 0x41c   :  { %972 = vmatprep.mubr.bf16.mxu1 %v1689_v20 }
 0x423   :  { %973 = vmatmul.mubr.bf16.gmra.mrb[4].mxu1 %v819_v30 }
 0x424   :  { %982 = vmatprep.mubr.bf16.mxu1 %v1689_v20 }
 0x42b   :  { %983 = vmatmul.mubr.bf16.gmra.mrb[8].mxu1 %v820_v44 }
 0x42c   :  { %992 = vmatprep.mubr.bf16.mxu1 %v1689_v20 }
 0x433   :  { %993 = vmatmul.mubr.bf16.gmra.mrb[12].mxu1 %v821_v31 }
 0x4ee   :  { %v964_v57 = vpop.f32.mrb[0].mxu1 }
 0x4ef   :  { %v965_v22 = vadd.f32 %v964_v57, %v843_v9  ;;  %v966_v27 = vpop.f32.mrb[1].mxu1 }
 0x4f0   :  { %v967_v61 = vadd.f32 %v966_v27, %v847_v7  ;;  %v968_v0 = vpop.f32.mrb[2].mxu1 }
 0x4f1   :  { %v970_v28 = vpop.f32.mrb[3].mxu1  ;;  %v969_v60 = vadd.f32 %v968_v0, %v843_v9 }
 0x4f2   :  { %v971_v4 = vadd.f32 %v970_v28, %v847_v7  ;;  %v1003_v11 = vmax.f32 %v965_v22, %v967_v61 }
 0x4f4   :  { %1004 = vmax.xlane.f32.xlu0 %v1003_v11  ;;  %v1006_v12 = vmax.f32 %v969_v60, %v971_v4 }
 0x4f6   :  { %v974_v20 = vpop.f32.mrb[4].mxu1 }
 0x4f7   :  { %v975_v13 = vadd.f32 %v974_v20, %v843_v9  ;;  %v976_v14 = vpop.f32.mrb[5].mxu1 }
 0x4f8   :  { %v977_v15 = vadd.f32 %v976_v14, %v847_v7  ;;  %v978_v16 = vpop.f32.mrb[6].mxu1  ;;  %1007 = vmax.xlane.f32.xlu0 %v1006_v12 }
 0x4f9   :  { %v980_v45 = vpop.f32.mrb[7].mxu1  ;;  %v979_v47 = vadd.f32 %v978_v16, %v843_v9 }
 0x4fa   :  { %v981_v17 = vadd.f32 %v980_v45, %v847_v7  ;;  %v1009_v18 = vmax.f32 %v975_v13, %v977_v15 }
 0x4fc   :  { %1010 = vmax.xlane.f32.xlu1 %v1009_v18  ;;  %v1012_v21 = vmax.f32 %v979_v47, %v981_v17 }
 0x4fe   :  { %v984_v19 = vpop.f32.mrb[8].mxu1 }
 0x4ff   :  { %v985_v23 = vadd.f32 %v984_v19, %v843_v9  ;;  %v986_v25 = vpop.f32.mrb[9].mxu1 }
 0x500   :  { %v987_v29 = vadd.f32 %v986_v25, %v847_v7  ;;  %v988_v33 = vpop.f32.mrb[10].mxu1  ;;  %1013 = vmax.xlane.f32.xlu1 %v1012_v21 }
 0x501   :  { %v989_v34 = vadd.f32 %v988_v33, %v843_v9  ;;  %v990_v35 = vpop.f32.mrb[11].mxu1 }
 0x502   :  { %v991_v36 = vadd.f32 %v990_v35, %v847_v7  ;;  %v1015_v37 = vmax.f32 %v985_v23, %v987_v29 }
 0x504   :  { %1016 = vmax.xlane.f32.xlu0 %v1015_v37  ;;  %v1018_v38 = vmax.f32 %v989_v34, %v991_v36 }
 0x506   :  { %v994_v39 = vpop.f32.mrb[12].mxu1  ;;  %1019 = vmax.xlane.f32.xlu1 %v1018_v38 }
 0x507   :  { %v2131_v40 = vadd.f32 %v994_v39, %v843_v9  ;;  %v996_v42 = vpop.f32.mrb[13].mxu1 }
 0x508   :  { %v2133_v46 = vadd.f32 %v996_v42, %v847_v7  ;;  %v998_v49 = vpop.f32.mrb[14].mxu1 }
 0x509   :  { %v2135_v50 = vadd.f32 %v998_v49, %v843_v9  ;;  %v1000_v51 = vpop.f32.mrb[15].mxu1 }
 0x50a   :  { %v2137_v52 = vadd.f32 %v1000_v51, %v847_v7  ;;  %v1021_v53 = vmax.f32 %v2131_v40, %v2133_v46 }
 0x50c   :  { %1022 = vmax.xlane.f32.xlu0 %v1021_v53  ;;  %v1024_v54 = vmax.f32 %v2135_v50, %v2137_v52 }
 0x50e   :  { %1025 = vmax.xlane.f32.xlu1 %v1024_v54 }
 0x581   :  { %v1005_v55 = vpop.xlane.xlu0 %1004 }
 0x582   :  { %v1027_v56 = vsub.f32 %v965_v22, %v1005_v55  ;;  %v1028_v58 = vsub.f32 %v967_v61, %v1005_v55 }
 0x584   :  { %v1043_v59 = vmul.f32 1.442695, %v1027_v56  ;;  %v1045_v62 = vmul.f32 1.442695, %v1028_v58 }
 0x585   :  { %v1008_v63 = vpop.xlane.xlu0 %1007 }
 0x586   :  { %1350 = vpow2.f32 %v1043_v59  ;;  %v1029_v2 = vsub.f32 %v969_v60, %v1008_v63  ;;  %v1030_v3 = vsub.f32 %v971_v4, %v1008_v63 }
 0x587   :  { %1352 = vpow2.f32 %v1045_v62 }
 0x588   :  { %v1047_v5 = vmul.f32 1.442695, %v1029_v2  ;;  %v1049_v6 = vmul.f32 1.442695, %v1030_v3 }
 0x589   :  { %v1011_v1 = vpop.xlane.xlu1 %1010 }
 0x58a   :  { %1354 = vpow2.f32 %v1047_v5  ;;  %v1031_v8 = vsub.f32 %v975_v13, %v1011_v1  ;;  %v1032_v32 = vsub.f32 %v977_v15, %v1011_v1 }
 0x58b   :  { %1356 = vpow2.f32 %v1049_v6 }
 0x58c   :  { %v1051_v10 = vmul.f32 1.442695, %v1031_v8  ;;  %v1053_v26 = vmul.f32 1.442695, %v1032_v32 }
 0x58d   :  { %v1014_v24 = vpop.xlane.xlu1 %1013 }
 0x58e   :  { %1358 = vpow2.f32 %v1051_v10  ;;  %v1033_v41 = vsub.f32 %v979_v47, %v1014_v24  ;;  %v1034_v30 = vsub.f32 %v981_v17, %v1014_v24 }
 0x58f   :  { %1360 = vpow2.f32 %v1053_v26 }
 0x590   :  { %v2143_v44 = vpop.eup %1350  ;;  %v1055_v31 = vmul.f32 1.442695, %v1033_v41  ;;  %v1057_v43 = vmul.f32 1.442695, %v1034_v30 }
 0x591   :  { %v2145_v48 = vpop.eup %1352  ;;  %v1017_v9 = vpop.xlane.xlu0 %1016 }
 0x592   :  { %1362 = vpow2.f32 %v1055_v31  ;;  %v1035_v7 = vsub.f32 %v985_v23, %v1017_v9  ;;  %v1036_v57 = vsub.f32 %v987_v29, %v1017_v9  ;;  %v1075_v22 = vadd.f32 %v2145_v48, %v2143_v44 }
 0x593   :  { %1364 = vpow2.f32 %v1057_v43  ;;  %v1020_v27 = vpop.xlane.xlu1 %1019 }
 0x594   :  { %v2149_v61 = vpop.eup %1354  ;;  %v1059_v0 = vmul.f32 1.442695, %v1035_v7  ;;  %v1061_v28 = vmul.f32 1.442695, %v1036_v57  ;;  %v1037_v60 = vsub.f32 %v989_v34, %v1020_v27  ;;  %v1038_v4 = vsub.f32 %v991_v36, %v1020_v27  ;;  %1076 = vadd.xlane.f32.xlu0 %v1075_v22 }
 0x595   :  { %v2151_v11 = vpop.eup %1356 }
 0x596   :  { %1366 = vpow2.f32 %v1059_v0  ;;  %v1063_v20 = vmul.f32 1.442695, %v1037_v60  ;;  %v1065_v12 = vmul.f32 1.442695, %v1038_v4  ;;  %v1078_v13 = vadd.f32 %v2151_v11, %v2149_v61 }
 0x597   :  { %1368 = vpow2.f32 %v1061_v28 }
 0x598   :  { %v2155_v14 = vpop.eup %1358  ;;  %1370 = vpow2.f32 %v1063_v20  ;;  %1079 = vadd.xlane.f32.xlu1 %v1078_v13 }
 0x599   :  { %v2157_v15 = vpop.eup %1360  ;;  %1372 = vpow2.f32 %v1065_v12  ;;  %v1023_v16 = vpop.xlane.xlu0 %1022 }
 0x59a   :  { %v1039_v45 = vsub.f32 %v2131_v40, %v1023_v16  ;;  %v1040_v47 = vsub.f32 %v2133_v46, %v1023_v16  ;;  %v1081_v17 = vadd.f32 %v2157_v15, %v2155_v14 }
 0x59b   :  { %v1026_v18 = vpop.xlane.xlu1 %1025 }
 0x59c   :  { %v2163_v19 = vpop.eup %1362  ;;  %v1067_v21 = vmul.f32 1.442695, %v1039_v45  ;;  %v1069_v23 = vmul.f32 1.442695, %v1040_v47  ;;  %v1041_v25 = vsub.f32 %v2135_v50, %v1026_v18  ;;  %v1042_v29 = vsub.f32 %v2137_v52, %v1026_v18  ;;  %1082 = vadd.xlane.f32.xlu0 %v1081_v17 }
 0x59d   :  { %v2167_v33 = vpop.eup %1364 }
 0x59e   :  { %1374 = vpow2.f32 %v1067_v21  ;;  %v1071_v34 = vmul.f32 1.442695, %v1041_v25  ;;  %v1073_v35 = vmul.f32 1.442695, %v1042_v29  ;;  %v1084_v36 = vadd.f32 %v2167_v33, %v2163_v19 }
 0x59f   :  { %1376 = vpow2.f32 %v1069_v23 }
 0x5a0   :  { %v2171_v37 = vpop.eup %1366  ;;  %1378 = vpow2.f32 %v1071_v34  ;;  %1085 = vadd.xlane.f32.xlu1 %v1084_v36 }
 0x5a1   :  { %v2173_v38 = vpop.eup %1368  ;;  %1380 = vpow2.f32 %v1073_v35 }
 0x5a2   :  { %v2175_v39 = vpop.eup %1370  ;;  %v1087_v40 = vadd.f32 %v2173_v38, %v2171_v37 }
 0x5a3   :  { %v2179_v42 = vpop.eup %1372 }
 0x5a4   :  { %1088 = vadd.xlane.f32.xlu0 %v1087_v40  ;;  %v1090_v46 = vadd.f32 %v2179_v42, %v2175_v39 }
 0x5a6   :  { %1091 = vadd.xlane.f32.xlu1 %v1090_v46 }
 0x5a8   :  { %v2183_v49 = vpop.eup %1374 }
 0x5a9   :  { %v2185_v50 = vpop.eup %1376 }
 0x5aa   :  { %v2187_v51 = vpop.eup %1378  ;;  %v1093_v52 = vadd.f32 %v2185_v50, %v2183_v49 }
 0x5ab   :  { %v2191_v53 = vpop.eup %1380 }
 0x5ac   :  { %1094 = vadd.xlane.f32.xlu0 %v1093_v52  ;;  %v1096_v54 = vadd.f32 %v2191_v53, %v2187_v51 }
 0x5ae   :  { %1097 = vadd.xlane.f32.xlu1 %v1096_v54 }
 0x621   :  { %v1077_v55 = vpop.xlane.xlu0 %1076 }
 0x622   :  { %1382 = vrcp.f32 %v1077_v55  ;;  %v1099_v59 = vmul.f32 0.00390625, %v1077_v55 }
 0x624   :  { %vm1107_vm3 = vcmp.lt.f32.partialorder %v2143_v44, %v1099_v59  ;;  %vm1108_vm4 = vcmp.lt.f32.partialorder %v2145_v48, %v1099_v59 }
 0x625   :  { %v1080_v56 = vpop.xlane.xlu1 %1079 }
 0x626   :  { %1384 = vrcp.f32 %v1080_v56  ;;  %v1100_v5 = vmul.f32 0.00390625, %v1080_v56 }
 0x628   :  { %vm1109_vm5 = vcmp.lt.f32.partialorder %v2149_v61, %v1100_v5  ;;  %vm1110_vm6 = vcmp.lt.f32.partialorder %v2151_v11, %v1100_v5 }
 0x629   :  { %v1083_v58 = vpop.xlane.xlu0 %1082 }
 0x62a   :  { %1386 = vrcp.f32 %v1083_v58  ;;  %v1101_v24 = vmul.f32 0.00390625, %v1083_v58 }
 0x62c   :  { %v1383_v62 = vpop.eup %1382  ;;  %vm1111_vm7 = vcmp.lt.f32.partialorder %v2155_v14, %v1101_v24  ;;  %vm1112_vm8 = vcmp.lt.f32.partialorder %v2157_v15, %v1101_v24 }
 0x62d   :  { %v1131_v63 = vmul.f32 %v1383_v62, %v2143_v44  ;;  %v1132_v2 = vmul.f32 %v1383_v62, %v2145_v48  ;;  %v1086_v3 = vpop.xlane.xlu1 %1085 }
 0x62e   :  { %1388 = vrcp.f32 %v1086_v3  ;;  %v1102_v9 = vmul.f32 0.00390625, %v1086_v3 }
 0x62f   :  { %v1147_v6 = vsel %vm1107_vm3, %v1131_v63, 1.0  ;;  %v1148_v1 = vsel %vm1108_vm4, %v1132_v2, 1.0 }
 0x630   :  { %v1385_v8 = vpop.eup %1384  ;;  %1163 = vst [vmem:[#allocation20] sm:$0xff] %v1147_v6  ;;  %1164 = vst [vmem:[#allocation20 + $0x8] sm:$0xff] %v1148_v1  ;;  %vm1113_vm9 = vcmp.lt.f32.partialorder %v2163_v19, %v1102_v9  ;;  %vm1114_vm10 = vcmp.lt.f32.partialorder %v2167_v33, %v1102_v9 }
 0x631   :  { %v1133_v32 = vmul.f32 %v1385_v8, %v2149_v61  ;;  %v1134_v10 = vmul.f32 %v1385_v8, %v2151_v11  ;;  %v1089_v26 = vpop.xlane.xlu0 %1088 }
 0x632   :  { %1390 = vrcp.f32 %v1089_v26  ;;  %v1103_v28 = vmul.f32 0.00390625, %v1089_v26 }
 0x633   :  { %v1149_v41 = vsel %vm1109_vm5, %v1133_v32, 1.0  ;;  %v1150_v30 = vsel %vm1110_vm6, %v1134_v10, 1.0  ;;  %v1092_v44 = vpop.xlane.xlu1 %1091 }
 0x634   :  { %v1387_v31 = vpop.eup %1386  ;;  %1165 = vst [vmem:[#allocation20 + $0x10] sm:$0xff] %v1149_v41  ;;  %1166 = vst [vmem:[#allocation20 + $0x18] sm:$0xff] %v1150_v30  ;;  %1392 = vrcp.f32 %v1092_v44  ;;  %v1104_v12 = vmul.f32 0.00390625, %v1092_v44  ;;  %vm1115_vm11 = vcmp.lt.f32.partialorder %v2171_v37, %v1103_v28  ;;  %vm1116_vm12 = vcmp.lt.f32.partialorder %v2173_v38, %v1103_v28 }
 0x635   :  { %v1135_v43 = vmul.f32 %v1387_v31, %v2155_v14  ;;  %v1136_v48 = vmul.f32 %v1387_v31, %v2157_v15 }
 0x636   :  { %vm1117_vm13 = vcmp.lt.f32.partialorder %v2175_v39, %v1104_v12  ;;  %vm1118_vm14 = vcmp.lt.f32.partialorder %v2179_v42, %v1104_v12 }
 0x637   :  { %v1151_v7 = vsel %vm1111_vm7, %v1135_v43, 1.0  ;;  %v1152_v57 = vsel %vm1112_vm8, %v1136_v48, 1.0 }
 0x638   :  { %v1389_v22 = vpop.eup %1388  ;;  %1167 = vst [vmem:[#allocation20 + $0x20] sm:$0xff] %v1151_v7  ;;  %1168 = vst [vmem:[#allocation20 + $0x28] sm:$0xff] %v1152_v57 }
 0x639   :  { %v1137_v27 = vmul.f32 %v1389_v22, %v2163_v19  ;;  %v1138_v61 = vmul.f32 %v1389_v22, %v2167_v33  ;;  %v1095_v0 = vpop.xlane.xlu0 %1094 }
 0x63a   :  { %1394 = vrcp.f32 %v1095_v0  ;;  %v1105_v21 = vmul.f32 0.00390625, %v1095_v0 }
 0x63b   :  { %v1153_v60 = vsel %vm1113_vm9, %v1137_v27, 1.0  ;;  %v1154_v4 = vsel %vm1114_vm10, %v1138_v61, 1.0  ;;  %v1098_v11 = vpop.xlane.xlu1 %1097 }
 0x63c   :  { %v1391_v20 = vpop.eup %1390  ;;  %1169 = vst [vmem:[#allocation20 + $0x30] sm:$0xff] %v1153_v60  ;;  %1170 = vst [vmem:[#allocation20 + $0x38] sm:$0xff] %v1154_v4  ;;  %1396 = vrcp.f32 %v1098_v11  ;;  %v1106_v25 = vmul.f32 0.00390625, %v1098_v11  ;;  %vm1119_vm15 = vcmp.lt.f32.partialorder %v2183_v49, %v1105_v21  ;;  %vm1120_vm0 = vcmp.lt.f32.partialorder %v2185_v50, %v1105_v21 }
 0x63d   :  { %v1139_v13 = vmul.f32 %v1391_v20, %v2171_v37  ;;  %v1140_v14 = vmul.f32 %v1391_v20, %v2173_v38 }
 0x63e   :  { %v1393_v15 = vpop.eup %1392  ;;  %vm1121_vm1 = vcmp.lt.f32.partialorder %v2187_v51, %v1106_v25  ;;  %vm1122_vm2 = vcmp.lt.f32.partialorder %v2191_v53, %v1106_v25 }
 0x63f   :  { %v1155_v16 = vsel %vm1115_vm11, %v1139_v13, 1.0  ;;  %v1156_v45 = vsel %vm1116_vm12, %v1140_v14, 1.0  ;;  %v1141_v47 = vmul.f32 %v1393_v15, %v2175_v39  ;;  %v1142_v17 = vmul.f32 %v1393_v15, %v2179_v42 }
 0x640   :  { %1171 = vst [vmem:[#allocation20 + $0x40] sm:$0xff] %v1155_v16  ;;  %1172 = vst [vmem:[#allocation20 + $0x48] sm:$0xff] %v1156_v45 }
 0x641   :  { %v1157_v18 = vsel %vm1117_vm13, %v1141_v47, 1.0  ;;  %v1158_v19 = vsel %vm1118_vm14, %v1142_v17, 1.0 }
 0x642   :  { %1173 = vst [vmem:[#allocation20 + $0x50] sm:$0xff] %v1157_v18  ;;  %1174 = vst [vmem:[#allocation20 + $0x58] sm:$0xff] %v1158_v19 }
 0x644   :  { %v1395_v23 = vpop.eup %1394 }
 0x645   :  { %v1143_v29 = vmul.f32 %v1395_v23, %v2183_v49  ;;  %v1144_v33 = vmul.f32 %v1395_v23, %v2185_v50 }
 0x646   :  { %v1397_v34 = vpop.eup %1396 }
 0x647   :  { %v1159_v35 = vsel %vm1119_vm15, %v1143_v29, 1.0  ;;  %v1160_v36 = vsel %vm1120_vm0, %v1144_v33, 1.0  ;;  %v1145_v37 = vmul.f32 %v1397_v34, %v2187_v51  ;;  %v1146_v38 = vmul.f32 %v1397_v34, %v2191_v53 }
 0x648   :  { %1175 = vst [vmem:[#allocation20 + $0x60] sm:$0xff] %v1159_v35  ;;  %1176 = vst [vmem:[#allocation20 + $0x68] sm:$0xff] %v1160_v36 }
 0x649   :  { %v1161_v39 = vsel %vm1121_vm1, %v1145_v37, 1.0  ;;  %v1162_v40 = vsel %vm1122_vm2, %v1146_v38, 1.0 }
 0x64a   :  { %1177 = vst [vmem:[#allocation20 + $0x70] sm:$0xff] %v1161_v39  ;;  %1178 = vst [vmem:[#allocation20 + $0x78] sm:$0xff] %v1162_v40 }
 0x64b   :  { %1651 = shalt.err (!%p1648_p8)
}
 0x64c   :  { %s1652_s18 = scalar_lea.hbm %s2254_s15, 2048 }
 0x64d   :  { %p1653_p9 = scmp.ne.s32.totalorder %s2254_s15, %s1652_s18  ;;  %p1656_p10 = scmp.lt.u32.totalorder %s1652_s18, %s2254_s15 }
 0x64f   :  { %p1658_p11 = pnand %p1656_p10, %p1653_p9 }
 0x651   :  { %1661 = shalt.err (!%p1658_p11)
}
 0x652   :  { %s1691_s12 = smov 256   ;;  %s1692_s16 = smov 16  }
 0x653   :  { %1190 = dma.vmem_to_hbm [thread:$0]  %s1185_s3, 2048, %s2254_s15, [#allocation4], %s1691_s12, %s1691_s12, %s1692_s16  }
 0x654   :  { %1674 = dma.done.wait [#allocation4], 2048  }
 0x655   :  { %1675 = vsyncadd [#allocation4], 4294965248 }
 0x656   :  { %1194 = vsyncpa [#allocation3], 1 }
 0x657   :  { %1195 = vsyncpa [#allocation6], 1 }
 0x658   :  { %1196 = vsyncpa [#allocation9], 1 }
 0x659   :  { %1197 = vsyncpa [#allocation12], 1 }
 0x65a   :  { %1198 = vsyncpa [#allocation15], 1 }
 0x65b   :  { %1199 = vsyncpa [#allocation18], 1 }
 0x65c   :  { %1200 = vsyncpa [#allocation4], 1 }

</bundles_post_ra>
